<compile_context>
chip_gen: v7x
topology: tpu7x:2x2x1
jax: 0.10.0
libtpu: 0.0.40
codegen_flags: <defaults>
</compile_context>

<pallas_src>
import functools

import numpy as np
import jax
import jax.numpy as jnp
from jax.experimental import pallas as pl
from jax.experimental.pallas import tpu as pltpu

EPS = 1e-5            # PyTorch BatchNorm default eps
LEAKY_SLOPE = 0.1


def _full_spec(shape):
    shape = tuple(int(s) for s in shape)
    zeros = (0,) * len(shape)
    return pl.BlockSpec(shape, lambda i: zeros)


# ----------------------------------------------------------------------------
# Fused kernel: conv1 block -> conv2 block -> dense tail, all in VMEM
# ----------------------------------------------------------------------------
def _variant2_kernel(lhs1_ref, rhs1_ref, cb1_ref, fold1_ref, bcast1_ref,
                     rhs2_ref, cb2_ref, fold2_ref, bcast2_ref,
                     dw1p_ref, cd1_ref, dw2p_ref, cd2_ref, dw3p_ref, db3_ref,
                     o_ref, *, nb):
    f32, bf16 = jnp.float32, jnp.bfloat16

    def pool_w(r):                               # max over the W pool phase
        return jnp.maximum(r[:, :128], r[:, 128:256])

    def bias_act_bn(hmax, crow, fold, bcast, count):
        # conv bias and the monotone LeakyReLU commute with max -> apply once
        act = hmax + crow[0:1, :]
        act = jnp.where(act >= 0.0, act, LEAKY_SLOPE * act)
        inv_cnt = 1.0 / count
        mean_c = jnp.dot(jnp.sum(act, axis=0, keepdims=True), fold,
                         preferred_element_type=f32) * inv_cnt          # (1, C)
        mean_row = jnp.dot(mean_c, bcast, preferred_element_type=f32)   # (1, 128)
        cent = act - mean_row
        var_c = jnp.dot(jnp.sum(cent * cent, axis=0, keepdims=True), fold,
                        preferred_element_type=f32) * inv_cnt           # biased, two-pass
        inv_row = jnp.dot(jax.lax.rsqrt(var_c + EPS), bcast,
                          preferred_element_type=f32)
        scale_row = inv_row * crow[1:2, :]
        shift_row = crow[2:3, :] - mean_row * scale_row
        return act * scale_row + shift_row       # padding lanes stay exactly 0

    # ---------------- conv block 1: one (24N,140)x(140,256) MXU matmul ----------------
    r1 = jnp.dot(lhs1_ref[...], rhs1_ref[...], preferred_element_type=f32)
    hmax1 = jnp.maximum(pool_w(r1[:12 * nb]), pool_w(r1[12 * nb:]))      # H pool phase
    p1 = bias_act_bn(hmax1, cb1_ref[...], fold1_ref[...], bcast1_ref[...], 144 * nb)
    # p1: (12N, 128) f32, rows = (ph1 parity, ph1 // 2, n), lanes = pw1*8 + ci

    # ---- conv block 2 LHS: row-shifted windows of the VMEM-resident p1 ----
    ri = jax.lax.broadcasted_iota(jnp.int32, (5 * nb, 128), 0)
    seg = [None] * 6                             # seg[q]: padded conv-2 rows 2*ph2 + q
    seg[0] = jnp.where(ri >= nb, p1[5 * nb:10 * nb], 0.0)    # top H-pad row at ph2 == 0
    seg[1] = p1[0:5 * nb]
    seg[2] = p1[6 * nb:11 * nb]
    seg[3] = p1[nb:6 * nb]
    seg[4] = p1[7 * nb:12 * nb]
    seg[5] = jnp.where(ri < 4 * nb, p1[2 * nb:7 * nb], 0.0)  # bottom H-pad row at ph2 == 4
    blk0 = jnp.concatenate(seg[0:5], axis=1).astype(bf16)    # (5N, 640)  H phase 0
    blk1 = jnp.concatenate(seg[1:6], axis=1).astype(bf16)    # (5N, 640)  H phase 1

    # ---------------- conv block 2: two (5N,640)x(640,256) MXU matmuls ----------------
    r2a = pool_w(jnp.dot(blk0, rhs2_ref[...], preferred_element_type=f32))
    r2b = pool_w(jnp.dot(blk1, rhs2_ref[...], preferred_element_type=f32))
    p2 = bias_act_bn(jnp.maximum(r2a, r2b), cb2_ref[...], fold2_ref[...],
                     bcast2_ref[...], 25 * nb)
    # p2: (5N, 128) f32, rows = (ph2, n), lanes = pw2*16 + co

    # ---------------- dense tail (intermediates stay in VMEM) ----------------
    xd = jnp.concatenate([p2[h * nb:(h + 1) * nb] for h in range(5)],
                         axis=1).astype(bf16)                # (N, 640)

    def bn_rows(h, g_row, be_row):
        mu = jnp.mean(h, axis=0, keepdims=True)
        d = h - mu
        var = jnp.mean(d * d, axis=0, keepdims=True)         # biased, two-pass
        return d * jax.lax.rsqrt(var + EPS) * g_row + be_row

    h1 = jnp.dot(xd, dw1p_ref[...], preferred_element_type=f32) + cd1_ref[0:1, :]
    h1 = bn_rows(h1, cd1_ref[1:2, :], cd1_ref[2:3, :])
    h2 = jnp.dot(h1.astype(bf16), dw2p_ref[...], preferred_element_type=f32) + cd2_ref[0:1, :]
    h2 = bn_rows(h2, cd2_ref[1:2, :], cd2_ref[2:3, :])
    o_ref[...] = jnp.dot(h2.astype(bf16), dw3p_ref[...],
                         preferred_element_type=f32) + db3_ref[...]


# ----------------------------------------------------------------------------
# One-time parameter prep (hoisted off the per-forward hot path)
# ----------------------------------------------------------------------------
def prepare_params(p):
    f32, bf16 = jnp.float32, jnp.bfloat16

    # conv1 block-Toeplitz RHS: rows = di*28 + padded-W, cols = wpar*128 + pw*8 + co
    A = np.zeros((5, 28, 2, 12), np.float32)            # (dj, wp, wpar, pw)
    for dj in range(5):
        for wpar in range(2):
            for pw in range(12):
                A[dj, 2 * pw + wpar + dj, wpar, pw] = 1.0
    t1 = jnp.einsum('jwup,djo->dwupo', jnp.asarray(A),
                    p["w1"].astype(f32).reshape(5, 5, 8))
    rhs1 = jnp.pad(t1.reshape(140, 2, 96),
                   ((0, 0), (0, 0), (0, 32))).reshape(140, 256).astype(bf16)

    # conv2 block-Toeplitz RHS (W padding folded in):
    # rows = di*128 + pw1*8 + ci, cols = wpar*128 + pw2*16 + co
    B = np.zeros((5, 12, 2, 5), np.float32)             # (dj, pw1, wpar, pw2)
    for dj in range(5):
        for wpar in range(2):
            for pw2 in range(5):
                pw1 = 2 * pw2 + wpar + dj - 1
                if 0 <= pw1 < 12:
                    B[dj, pw1, wpar, pw2] = 1.0
    t2 = jnp.einsum('jwup,djio->dwiupo', jnp.asarray(B), p["w2"].astype(f32))
    rhs2 = jnp.pad(t2.reshape(5, 96, 2, 80),
                   ((0, 0), (0, 32), (0, 0), (0, 48))).reshape(640, 256).astype(bf16)

    def conv_rows(b, g, be, groups, pad_to):
        row = lambda v: jnp.pad(jnp.tile(v.astype(f32), groups),
                                (0, pad_to - v.shape[0] * groups))
        return jnp.stack([row(b), row(g), row(be)], axis=0)      # (3, pad_to)
    cb1 = conv_rows(p["b1"], p["g1"], p["beta1"], 12, 128)
    cb2 = conv_rows(p["b2"], p["g2"], p["beta2"], 5, 128)

    fold1 = jnp.asarray(np.pad(np.tile(np.eye(8, dtype=np.float32), (12, 1)),
                               ((0, 32), (0, 0))))               # (128, 8)
    fold2 = jnp.asarray(np.pad(np.tile(np.eye(16, dtype=np.float32), (5, 1)),
                               ((0, 48), (0, 0))))               # (128, 16)

    # dense1: fold PyTorch's NCHW flatten and the lane-padded conv-2 layout into rows
    dw1_ext = jnp.concatenate([p["dw1"].astype(f32), jnp.zeros((1, 200), f32)], axis=0)
    src = np.full((5, 8, 16), 400, np.int32)            # (h, lane group w, c); 400 -> zero row
    for h in range(5):
        for w in range(5):
            for c in range(16):
                src[h, w, c] = c * 25 + h * 5 + w
    dw1p = jnp.pad(jnp.take(dw1_ext, jnp.asarray(src.reshape(-1)), axis=0),
                   ((0, 0), (0, 56))).astype(bf16)                      # (640, 256)
    dw2p = jnp.pad(p["dw2"].astype(f32), ((0, 56), (0, 78))).astype(bf16)   # (256, 128)
    dw3p = jnp.pad(p["ow"].astype(f32), ((0, 78), (0, 118))).astype(bf16)   # (128, 128)

    def dense_rows(b, g, be, pad_to):
        row = lambda v: jnp.pad(v.astype(f32), (0, pad_to - v.shape[0]))
        return jnp.stack([row(b), row(g), row(be)], axis=0)
    cd1 = dense_rows(p["db1"], p["dg1"], p["dbeta1"], 256)
    cd2 = dense_rows(p["db2"], p["dg2"], p["dbeta2"], 128)
    db3 = jnp.pad(p["ob"].astype(f32), (0, 118)).reshape(1, 128)

    return dict(rhs1=rhs1, cb1=cb1, fold1=fold1, bcast1=fold1.T,
                rhs2=rhs2, cb2=cb2, fold2=fold2, bcast2=fold2.T,
                dw1p=dw1p, cd1=cd1, dw2p=dw2p, cd2=cd2, dw3p=dw3p, db3=db3)


# ----------------------------------------------------------------------------
# Per-forward wrapper
# ----------------------------------------------------------------------------
def _build_lhs1(x_nchw):
    """H-only stacked (im2col-in-H) padded input, rows = (hpar, ph parity, ph//2, n),
    lanes = di*28 + padded-W -> one (24N, 140) bf16 LHS for conv block 1."""
    N = x_nchw.shape[0]
    xpad = jnp.pad(x_nchw.reshape(N, 26, 26), ((0, 0), (1, 1), (1, 1)))   # (N, 28, 28)
    idx = (np.arange(2)[:, None, None, None]            # hpar
           + 2 * np.arange(2)[None, :, None, None]      # ph parity
           + 4 * np.arange(6)[None, None, :, None]      # ph // 2
           + np.arange(5)[None, None, None, :])         # di
    g = jnp.take(xpad, jnp.asarray(idx.reshape(-1)), axis=1)              # (N, 120, 28)
    g = g.reshape(N, 2, 2, 6, 5, 28)
    return jnp.transpose(g, (1, 2, 3, 0, 4, 5)).reshape(24 * N, 140).astype(jnp.bfloat16)


def variant2_forward(x_nchw, pp):
    N = x_nchw.shape[0]
    lhs1 = _build_lhs1(x_nchw)
    args = (lhs1, pp["rhs1"], pp["cb1"], pp["fold1"], pp["bcast1"],
            pp["rhs2"], pp["cb2"], pp["fold2"], pp["bcast2"],
            pp["dw1p"], pp["cd1"], pp["dw2p"], pp["cd2"], pp["dw3p"], pp["db3"])
    flops = int(2 * N * (24 * 140 * 256 + 10 * 640 * 256 + 640 * 256
                         + 256 * 128 + 128 * 128))
    bytes_acc = int(sum(int(a.size) * a.dtype.itemsize for a in args) + N * 128 * 4)

    out = pl.pallas_call(
        functools.partial(_variant2_kernel, nb=N),
        out_shape=jax.ShapeDtypeStruct((N, 128), jnp.float32),
        grid=(1,),
        in_specs=[_full_spec(a.shape) for a in args],
        out_specs=_full_spec((N, 128)),
        compiler_params=pltpu.CompilerParams(dimension_semantics=("arbitrary",)),
        cost_estimate=pl.CostEstimate(flops=flops, transcendentals=512,
                                      bytes_accessed=bytes_acc),
    )(*args)
    return out[:, :10]


# ----------------------------------------------------------------------------
# Parameter init (same conventions as the original script; W stored as (in, out))
# ----------------------------------------------------------------------------
def init_params(key):
    ks = jax.random.split(key, 16)
    f32 = jnp.float32
    p = {
        "w1": jax.random.normal(ks[0], (5, 5, 1, 8), f32) * 0.1,
        "b1": jax.random.normal(ks[1], (8,), f32) * 0.1,
        "g1": 1.0 + 0.1 * jax.random.normal(ks[2], (8,), f32),
        "beta1": 0.1 * jax.random.normal(ks[3], (8,), f32),
        "w2": jax.random.normal(ks[4], (5, 5, 8, 16), f32) * 0.05,
        "b2": jax.random.normal(ks[5], (16,), f32) * 0.1,
        "g2": 1.0 + 0.1 * jax.random.normal(ks[6], (16,), f32),
        "beta2": 0.1 * jax.random.normal(ks[7], (16,), f32),
        "dw1": jax.random.normal(ks[8], (400, 200), f32) * 0.05,
        "db1": jax.random.normal(ks[9], (200,), f32) * 0.1,
        "dg1": 1.0 + 0.1 * jax.random.normal(ks[10], (200,), f32),
        "dbeta1": 0.1 * jax.random.normal(ks[11], (200,), f32),
        "dw2": jax.random.normal(ks[12], (200, 50), f32) * 0.05,
        "db2": jax.random.normal(ks[13], (50,), f32) * 0.1,
        "dg2": 1.0 + 0.1 * jax.random.normal(ks[14], (50,), f32),
        "dbeta2": 0.1 * jax.random.normal(ks[15], (50,), f32),
    }
    k_ow, k_ob = jax.random.split(jax.random.fold_in(key, 99))
    p["ow"] = jax.random.normal(k_ow, (50, 10), f32) * 0.1
    p["ob"] = jax.random.normal(k_ob, (10,), f32) * 0.1
    return p


if __name__ == "__main__":
    key = jax.random.PRNGKey(0)
    k_x, k_p = jax.random.split(key)
    # Input must be (N, 1, 26, 26) so the flatten sees 16*5*5 features (as in Conv.py).
    x = jax.random.normal(k_x, (2, 1, 26, 26), jnp.float32)
    params = init_params(k_p)
    prepped = prepare_params(params)          # one-time weight prep (off the hot path)

    fwd = jax.jit(variant2_forward)
    out = jax.block_until_ready(fwd(x, prepped))
    assert out.shape == (2, 10) and out.dtype == jnp.float32
    assert bool(jnp.all(jnp.isfinite(out)))
    print("KERNEL_OK")
</pallas_src>

<mosaic_0001>
module attributes {stable_mosaic.version = 11 : i64} {
  func.func @_variant2_kernel(%arg0: i32, %arg1: memref<48x140xbf16, #tpu.memory_space<vmem>>, %arg2: memref<140x256xbf16, #tpu.memory_space<vmem>>, %arg3: memref<3x128xf32, #tpu.memory_space<vmem>>, %arg4: memref<128x8xf32, #tpu.memory_space<vmem>>, %arg5: memref<8x128xf32, #tpu.memory_space<vmem>>, %arg6: memref<640x256xbf16, #tpu.memory_space<vmem>>, %arg7: memref<3x128xf32, #tpu.memory_space<vmem>>, %arg8: memref<128x16xf32, #tpu.memory_space<vmem>>, %arg9: memref<16x128xf32, #tpu.memory_space<vmem>>, %arg10: memref<640x256xbf16, #tpu.memory_space<vmem>>, %arg11: memref<3x256xf32, #tpu.memory_space<vmem>>, %arg12: memref<256x128xbf16, #tpu.memory_space<vmem>>, %arg13: memref<3x128xf32, #tpu.memory_space<vmem>>, %arg14: memref<128x128xbf16, #tpu.memory_space<vmem>>, %arg15: memref<1x128xf32, #tpu.memory_space<vmem>>, %arg16: memref<2x128xf32, #tpu.memory_space<vmem>>) attributes {dimension_semantics = [#tpu.dimension_semantics<arbitrary>], iteration_bounds = array<i64: 1>, scalar_prefetch = 0 : i64, scratch_operands = 0 : i64, tpu.core_type = #tpu.core_type<tc>, window_params = [{pipeline_mode = #tpu.pipeline_mode<synchronous>, transform_indices = @transform_0, window_bounds = array<i64: 48, 140>}, {pipeline_mode = #tpu.pipeline_mode<synchronous>, transform_indices = @transform_1, window_bounds = array<i64: 140, 256>}, {pipeline_mode = #tpu.pipeline_mode<synchronous>, transform_indices = @transform_2, window_bounds = array<i64: 3, 128>}, {pipeline_mode = #tpu.pipeline_mode<synchronous>, transform_indices = @transform_3, window_bounds = array<i64: 128, 8>}, {pipeline_mode = #tpu.pipeline_mode<synchronous>, transform_indices = @transform_4, window_bounds = array<i64: 8, 128>}, {pipeline_mode = #tpu.pipeline_mode<synchronous>, transform_indices = @transform_5, window_bounds = array<i64: 640, 256>}, {pipeline_mode = #tpu.pipeline_mode<synchronous>, transform_indices = @transform_6, window_bounds = array<i64: 3, 128>}, {pipeline_mode = #tpu.pipeline_mode<synchronous>, transform_indices = @transform_7, window_bounds = array<i64: 128, 16>}, {pipeline_mode = #tpu.pipeline_mode<synchronous>, transform_indices = @transform_8, window_bounds = array<i64: 16, 128>}, {pipeline_mode = #tpu.pipeline_mode<synchronous>, transform_indices = @transform_9, window_bounds = array<i64: 640, 256>}, {pipeline_mode = #tpu.pipeline_mode<synchronous>, transform_indices = @transform_10, window_bounds = array<i64: 3, 256>}, {pipeline_mode = #tpu.pipeline_mode<synchronous>, transform_indices = @transform_11, window_bounds = array<i64: 256, 128>}, {pipeline_mode = #tpu.pipeline_mode<synchronous>, transform_indices = @transform_12, window_bounds = array<i64: 3, 128>}, {pipeline_mode = #tpu.pipeline_mode<synchronous>, transform_indices = @transform_13, window_bounds = array<i64: 128, 128>}, {pipeline_mode = #tpu.pipeline_mode<synchronous>, transform_indices = @transform_14, window_bounds = array<i64: 1, 128>}, {pipeline_mode = #tpu.pipeline_mode<synchronous>, transform_indices = @transform_15, window_bounds = array<i64: 2, 128>}]} {
    %c0 = arith.constant 0 : index
    %c0_0 = arith.constant 0 : index
    %0 = vector.load %arg1[%c0, %c0_0] : memref<48x140xbf16, #tpu.memory_space<vmem>>, vector<48x140xbf16>
    %c0_1 = arith.constant 0 : index
    %c0_2 = arith.constant 0 : index
    %1 = vector.load %arg2[%c0_1, %c0_2] : memref<140x256xbf16, #tpu.memory_space<vmem>>, vector<140x256xbf16>
    %cst = arith.constant dense<0.000000e+00> : vector<48x256xf32>
    %2 = tpu.matmul %0, %1, %cst {dimension_numbers = #tpu.dot_dimension_numbers<[1], [0], [0], [1], [0, 0, 1, 1], [], []>} : vector<48x140xbf16>, vector<140x256xbf16>, vector<48x256xf32> -> vector<48x256xf32>
    %3 = vector.extract_strided_slice %2 {offsets = [0, 0], sizes = [24, 256], strides = [1, 1]} : vector<48x256xf32> to vector<24x256xf32>
    %4 = vector.extract_strided_slice %3 {offsets = [0, 0], sizes = [24, 128], strides = [1, 1]} : vector<24x256xf32> to vector<24x128xf32>
    %5 = vector.extract_strided_slice %3 {offsets = [0, 128], sizes = [24, 128], strides = [1, 1]} : vector<24x256xf32> to vector<24x128xf32>
    %6 = arith.maximumf %4, %5 : vector<24x128xf32>
    %7 = vector.extract_strided_slice %2 {offsets = [24, 0], sizes = [24, 256], strides = [1, 1]} : vector<48x256xf32> to vector<24x256xf32>
    %8 = vector.extract_strided_slice %7 {offsets = [0, 0], sizes = [24, 128], strides = [1, 1]} : vector<24x256xf32> to vector<24x128xf32>
    %9 = vector.extract_strided_slice %7 {offsets = [0, 128], sizes = [24, 128], strides = [1, 1]} : vector<24x256xf32> to vector<24x128xf32>
    %10 = arith.maximumf %8, %9 : vector<24x128xf32>
    %11 = arith.maximumf %6, %10 : vector<24x128xf32>
    %c0_3 = arith.constant 0 : index
    %c0_4 = arith.constant 0 : index
    %12 = vector.load %arg3[%c0_3, %c0_4] : memref<3x128xf32, #tpu.memory_space<vmem>>, vector<3x128xf32>
    %c0_5 = arith.constant 0 : index
    %c0_6 = arith.constant 0 : index
    %13 = vector.load %arg4[%c0_5, %c0_6] : memref<128x8xf32, #tpu.memory_space<vmem>>, vector<128x8xf32>
    %c0_7 = arith.constant 0 : index
    %c0_8 = arith.constant 0 : index
    %14 = vector.load %arg5[%c0_7, %c0_8] : memref<8x128xf32, #tpu.memory_space<vmem>>, vector<8x128xf32>
    %15 = vector.extract_strided_slice %12 {offsets = [0, 0], sizes = [1, 128], strides = [1, 1]} : vector<3x128xf32> to vector<1x128xf32>
    %16 = vector.broadcast %15 : vector<1x128xf32> to vector<24x128xf32>
    %17 = arith.addf %11, %16 : vector<24x128xf32>
    %cst_9 = arith.constant 0.000000e+00 : f32
    %18 = vector.broadcast %cst_9 : f32 to vector<24x128xf32>
    %19 = arith.cmpf oge, %17, %18 : vector<24x128xf32>
    %cst_10 = arith.constant 1.000000e-01 : f32
    %20 = vector.broadcast %cst_10 : f32 to vector<24x128xf32>
    %21 = arith.mulf %20, %17 : vector<24x128xf32>
    %22 = arith.select %19, %17, %21 : vector<24x128xi1>, vector<24x128xf32>
    %cst_11 = arith.constant dense<0.000000e+00> : vector<128xf32>
    %23 = vector.multi_reduction <add>, %22, %cst_11 [0] : vector<24x128xf32> to vector<128xf32>
    %24 = vector.shape_cast %23 : vector<128xf32> to vector<1x128xf32>
    %cst_12 = arith.constant dense<0.000000e+00> : vector<1x8xf32>
    %25 = tpu.matmul %24, %13, %cst_12 {dimension_numbers = #tpu.dot_dimension_numbers<[1], [0], [0], [1], [0, 0, 1, 1], [], []>} : vector<1x128xf32>, vector<128x8xf32>, vector<1x8xf32> -> vector<1x8xf32>
    %cst_13 = arith.constant 0.00347222225 : f32
    %26 = vector.broadcast %cst_13 : f32 to vector<1x8xf32>
    %27 = arith.mulf %25, %26 : vector<1x8xf32>
    %cst_14 = arith.constant dense<0.000000e+00> : vector<1x128xf32>
    %28 = tpu.matmul %27, %14, %cst_14 {dimension_numbers = #tpu.dot_dimension_numbers<[1], [0], [0], [1], [0, 0, 1, 1], [], []>} : vector<1x8xf32>, vector<8x128xf32>, vector<1x128xf32> -> vector<1x128xf32>
    %29 = vector.broadcast %28 : vector<1x128xf32> to vector<24x128xf32>
    %30 = arith.subf %22, %29 : vector<24x128xf32>
    %31 = arith.mulf %30, %30 : vector<24x128xf32>
    %cst_15 = arith.constant dense<0.000000e+00> : vector<128xf32>
    %32 = vector.multi_reduction <add>, %31, %cst_15 [0] : vector<24x128xf32> to vector<128xf32>
    %33 = vector.shape_cast %32 : vector<128xf32> to vector<1x128xf32>
    %cst_16 = arith.constant dense<0.000000e+00> : vector<1x8xf32>
    %34 = tpu.matmul %33, %13, %cst_16 {dimension_numbers = #tpu.dot_dimension_numbers<[1], [0], [0], [1], [0, 0, 1, 1], [], []>} : vector<1x128xf32>, vector<128x8xf32>, vector<1x8xf32> -> vector<1x8xf32>
    %cst_17 = arith.constant 0.00347222225 : f32
    %35 = vector.broadcast %cst_17 : f32 to vector<1x8xf32>
    %36 = arith.mulf %34, %35 : vector<1x8xf32>
    %cst_18 = arith.constant 9.99999974E-6 : f32
    %37 = vector.broadcast %cst_18 : f32 to vector<1x8xf32>
    %38 = arith.addf %36, %37 : vector<1x8xf32>
    %39 = math.rsqrt %38 : vector<1x8xf32>
    %cst_19 = arith.constant dense<0.000000e+00> : vector<1x128xf32>
    %40 = tpu.matmul %39, %14, %cst_19 {dimension_numbers = #tpu.dot_dimension_numbers<[1], [0], [0], [1], [0, 0, 1, 1], [], []>} : vector<1x8xf32>, vector<8x128xf32>, vector<1x128xf32> -> vector<1x128xf32>
    %41 = vector.extract_strided_slice %12 {offsets = [1, 0], sizes = [1, 128], strides = [1, 1]} : vector<3x128xf32> to vector<1x128xf32>
    %42 = arith.mulf %40, %41 : vector<1x128xf32>
    %43 = vector.extract_strided_slice %12 {offsets = [2, 0], sizes = [1, 128], strides = [1, 1]} : vector<3x128xf32> to vector<1x128xf32>
    %44 = arith.mulf %28, %42 : vector<1x128xf32>
    %45 = arith.subf %43, %44 : vector<1x128xf32>
    %46 = vector.broadcast %42 : vector<1x128xf32> to vector<24x128xf32>
    %47 = arith.mulf %22, %46 : vector<24x128xf32>
    %48 = vector.broadcast %45 : vector<1x128xf32> to vector<24x128xf32>
    %49 = arith.addf %47, %48 : vector<24x128xf32>
    %50 = tpu.iota {dimensions = array<i32: 0>} : vector<10x128xi32>
    %c2_i32 = arith.constant 2 : i32
    %51 = vector.broadcast %c2_i32 : i32 to vector<10x128xi32>
    %52 = arith.cmpi sge, %50, %51 : vector<10x128xi32>
    %53 = vector.extract_strided_slice %49 {offsets = [10, 0], sizes = [10, 128], strides = [1, 1]} : vector<24x128xf32> to vector<10x128xf32>
    %cst_20 = arith.constant 0.000000e+00 : f32
    %54 = vector.broadcast %cst_20 : f32 to vector<10x128xf32>
    %55 = arith.select %52, %53, %54 : vector<10x128xi1>, vector<10x128xf32>
    %56 = vector.extract_strided_slice %49 {offsets = [0, 0], sizes = [10, 128], strides = [1, 1]} : vector<24x128xf32> to vector<10x128xf32>
    %57 = vector.extract_strided_slice %49 {offsets = [12, 0], sizes = [10, 128], strides = [1, 1]} : vector<24x128xf32> to vector<10x128xf32>
    %58 = vector.extract_strided_slice %49 {offsets = [2, 0], sizes = [10, 128], strides = [1, 1]} : vector<24x128xf32> to vector<10x128xf32>
    %59 = vector.extract_strided_slice %49 {offsets = [14, 0], sizes = [10, 128], strides = [1, 1]} : vector<24x128xf32> to vector<10x128xf32>
    %c8_i32 = arith.constant 8 : i32
    %60 = vector.broadcast %c8_i32 : i32 to vector<10x128xi32>
    %61 = arith.cmpi slt, %50, %60 : vector<10x128xi32>
    %62 = vector.extract_strided_slice %49 {offsets = [4, 0], sizes = [10, 128], strides = [1, 1]} : vector<24x128xf32> to vector<10x128xf32>
    %cst_21 = arith.constant 0.000000e+00 : f32
    %63 = vector.broadcast %cst_21 : f32 to vector<10x128xf32>
    %64 = arith.select %61, %62, %63 : vector<10x128xi1>, vector<10x128xf32>
    %65 = tpu.concatenate %55, %56, %57, %58, %59 in 1 : vector<10x128xf32>, vector<10x128xf32>, vector<10x128xf32>, vector<10x128xf32>, vector<10x128xf32> -> vector<10x640xf32>
    %66 = arith.truncf %65 : vector<10x640xf32> to vector<10x640xbf16>
    %67 = tpu.concatenate %56, %57, %58, %59, %64 in 1 : vector<10x128xf32>, vector<10x128xf32>, vector<10x128xf32>, vector<10x128xf32>, vector<10x128xf32> -> vector<10x640xf32>
    %68 = arith.truncf %67 : vector<10x640xf32> to vector<10x640xbf16>
    %c0_22 = arith.constant 0 : index
    %c0_23 = arith.constant 0 : index
    %69 = vector.load %arg6[%c0_22, %c0_23] : memref<640x256xbf16, #tpu.memory_space<vmem>>, vector<640x256xbf16>
    %cst_24 = arith.constant dense<0.000000e+00> : vector<10x256xf32>
    %70 = tpu.matmul %66, %69, %cst_24 {dimension_numbers = #tpu.dot_dimension_numbers<[1], [0], [0], [1], [0, 0, 1, 1], [], []>} : vector<10x640xbf16>, vector<640x256xbf16>, vector<10x256xf32> -> vector<10x256xf32>
    %71 = vector.extract_strided_slice %70 {offsets = [0, 0], sizes = [10, 128], strides = [1, 1]} : vector<10x256xf32> to vector<10x128xf32>
    %72 = vector.extract_strided_slice %70 {offsets = [0, 128], sizes = [10, 128], strides = [1, 1]} : vector<10x256xf32> to vector<10x128xf32>
    %73 = arith.maximumf %71, %72 : vector<10x128xf32>
    %c0_25 = arith.constant 0 : index
    %c0_26 = arith.constant 0 : index
    %74 = vector.load %arg6[%c0_25, %c0_26] : memref<640x256xbf16, #tpu.memory_space<vmem>>, vector<640x256xbf16>
    %cst_27 = arith.constant dense<0.000000e+00> : vector<10x256xf32>
    %75 = tpu.matmul %68, %74, %cst_27 {dimension_numbers = #tpu.dot_dimension_numbers<[1], [0], [0], [1], [0, 0, 1, 1], [], []>} : vector<10x640xbf16>, vector<640x256xbf16>, vector<10x256xf32> -> vector<10x256xf32>
    %76 = vector.extract_strided_slice %75 {offsets = [0, 0], sizes = [10, 128], strides = [1, 1]} : vector<10x256xf32> to vector<10x128xf32>
    %77 = vector.extract_strided_slice %75 {offsets = [0, 128], sizes = [10, 128], strides = [1, 1]} : vector<10x256xf32> to vector<10x128xf32>
    %78 = arith.maximumf %76, %77 : vector<10x128xf32>
    %79 = arith.maximumf %73, %78 : vector<10x128xf32>
    %c0_28 = arith.constant 0 : index
    %c0_29 = arith.constant 0 : index
    %80 = vector.load %arg7[%c0_28, %c0_29] : memref<3x128xf32, #tpu.memory_space<vmem>>, vector<3x128xf32>
    %c0_30 = arith.constant 0 : index
    %c0_31 = arith.constant 0 : index
    %81 = vector.load %arg8[%c0_30, %c0_31] : memref<128x16xf32, #tpu.memory_space<vmem>>, vector<128x16xf32>
    %c0_32 = arith.constant 0 : index
    %c0_33 = arith.constant 0 : index
    %82 = vector.load %arg9[%c0_32, %c0_33] : memref<16x128xf32, #tpu.memory_space<vmem>>, vector<16x128xf32>
    %83 = vector.extract_strided_slice %80 {offsets = [0, 0], sizes = [1, 128], strides = [1, 1]} : vector<3x128xf32> to vector<1x128xf32>
    %84 = vector.broadcast %83 : vector<1x128xf32> to vector<10x128xf32>
    %85 = arith.addf %79, %84 : vector<10x128xf32>
    %cst_34 = arith.constant 0.000000e+00 : f32
    %86 = vector.broadcast %cst_34 : f32 to vector<10x128xf32>
    %87 = arith.cmpf oge, %85, %86 : vector<10x128xf32>
    %cst_35 = arith.constant 1.000000e-01 : f32
    %88 = vector.broadcast %cst_35 : f32 to vector<10x128xf32>
    %89 = arith.mulf %88, %85 : vector<10x128xf32>
    %90 = arith.select %87, %85, %89 : vector<10x128xi1>, vector<10x128xf32>
    %cst_36 = arith.constant dense<0.000000e+00> : vector<128xf32>
    %91 = vector.multi_reduction <add>, %90, %cst_36 [0] : vector<10x128xf32> to vector<128xf32>
    %92 = vector.shape_cast %91 : vector<128xf32> to vector<1x128xf32>
    %cst_37 = arith.constant dense<0.000000e+00> : vector<1x16xf32>
    %93 = tpu.matmul %92, %81, %cst_37 {dimension_numbers = #tpu.dot_dimension_numbers<[1], [0], [0], [1], [0, 0, 1, 1], [], []>} : vector<1x128xf32>, vector<128x16xf32>, vector<1x16xf32> -> vector<1x16xf32>
    %cst_38 = arith.constant 2.000000e-02 : f32
    %94 = vector.broadcast %cst_38 : f32 to vector<1x16xf32>
    %95 = arith.mulf %93, %94 : vector<1x16xf32>
    %cst_39 = arith.constant dense<0.000000e+00> : vector<1x128xf32>
    %96 = tpu.matmul %95, %82, %cst_39 {dimension_numbers = #tpu.dot_dimension_numbers<[1], [0], [0], [1], [0, 0, 1, 1], [], []>} : vector<1x16xf32>, vector<16x128xf32>, vector<1x128xf32> -> vector<1x128xf32>
    %97 = vector.broadcast %96 : vector<1x128xf32> to vector<10x128xf32>
    %98 = arith.subf %90, %97 : vector<10x128xf32>
    %99 = arith.mulf %98, %98 : vector<10x128xf32>
    %cst_40 = arith.constant dense<0.000000e+00> : vector<128xf32>
    %100 = vector.multi_reduction <add>, %99, %cst_40 [0] : vector<10x128xf32> to vector<128xf32>
    %101 = vector.shape_cast %100 : vector<128xf32> to vector<1x128xf32>
    %cst_41 = arith.constant dense<0.000000e+00> : vector<1x16xf32>
    %102 = tpu.matmul %101, %81, %cst_41 {dimension_numbers = #tpu.dot_dimension_numbers<[1], [0], [0], [1], [0, 0, 1, 1], [], []>} : vector<1x128xf32>, vector<128x16xf32>, vector<1x16xf32> -> vector<1x16xf32>
    %cst_42 = arith.constant 2.000000e-02 : f32
    %103 = vector.broadcast %cst_42 : f32 to vector<1x16xf32>
    %104 = arith.mulf %102, %103 : vector<1x16xf32>
    %cst_43 = arith.constant 9.99999974E-6 : f32
    %105 = vector.broadcast %cst_43 : f32 to vector<1x16xf32>
    %106 = arith.addf %104, %105 : vector<1x16xf32>
    %107 = math.rsqrt %106 : vector<1x16xf32>
    %cst_44 = arith.constant dense<0.000000e+00> : vector<1x128xf32>
    %108 = tpu.matmul %107, %82, %cst_44 {dimension_numbers = #tpu.dot_dimension_numbers<[1], [0], [0], [1], [0, 0, 1, 1], [], []>} : vector<1x16xf32>, vector<16x128xf32>, vector<1x128xf32> -> vector<1x128xf32>
    %109 = vector.extract_strided_slice %80 {offsets = [1, 0], sizes = [1, 128], strides = [1, 1]} : vector<3x128xf32> to vector<1x128xf32>
    %110 = arith.mulf %108, %109 : vector<1x128xf32>
    %111 = vector.extract_strided_slice %80 {offsets = [2, 0], sizes = [1, 128], strides = [1, 1]} : vector<3x128xf32> to vector<1x128xf32>
    %112 = arith.mulf %96, %110 : vector<1x128xf32>
    %113 = arith.subf %111, %112 : vector<1x128xf32>
    %114 = vector.broadcast %110 : vector<1x128xf32> to vector<10x128xf32>
    %115 = arith.mulf %90, %114 : vector<10x128xf32>
    %116 = vector.broadcast %113 : vector<1x128xf32> to vector<10x128xf32>
    %117 = arith.addf %115, %116 : vector<10x128xf32>
    %118 = vector.extract_strided_slice %117 {offsets = [0, 0], sizes = [2, 128], strides = [1, 1]} : vector<10x128xf32> to vector<2x128xf32>
    %119 = vector.extract_strided_slice %117 {offsets = [2, 0], sizes = [2, 128], strides = [1, 1]} : vector<10x128xf32> to vector<2x128xf32>
    %120 = vector.extract_strided_slice %117 {offsets = [4, 0], sizes = [2, 128], strides = [1, 1]} : vector<10x128xf32> to vector<2x128xf32>
    %121 = vector.extract_strided_slice %117 {offsets = [6, 0], sizes = [2, 128], strides = [1, 1]} : vector<10x128xf32> to vector<2x128xf32>
    %122 = vector.extract_strided_slice %117 {offsets = [8, 0], sizes = [2, 128], strides = [1, 1]} : vector<10x128xf32> to vector<2x128xf32>
    %123 = tpu.concatenate %118, %119, %120, %121, %122 in 1 : vector<2x128xf32>, vector<2x128xf32>, vector<2x128xf32>, vector<2x128xf32>, vector<2x128xf32> -> vector<2x640xf32>
    %124 = arith.truncf %123 : vector<2x640xf32> to vector<2x640xbf16>
    %c0_45 = arith.constant 0 : index
    %c0_46 = arith.constant 0 : index
    %125 = vector.load %arg10[%c0_45, %c0_46] : memref<640x256xbf16, #tpu.memory_space<vmem>>, vector<640x256xbf16>
    %cst_47 = arith.constant dense<0.000000e+00> : vector<2x256xf32>
    %126 = tpu.matmul %124, %125, %cst_47 {dimension_numbers = #tpu.dot_dimension_numbers<[1], [0], [0], [1], [0, 0, 1, 1], [], []>} : vector<2x640xbf16>, vector<640x256xbf16>, vector<2x256xf32> -> vector<2x256xf32>
    %c0_48 = arith.constant 0 : index
    %c0_49 = arith.constant 0 : index
    %127 = vector.load %arg11[%c0_48, %c0_49] : memref<3x256xf32, #tpu.memory_space<vmem>>, vector<1x256xf32>
    %128 = vector.broadcast %127 : vector<1x256xf32> to vector<2x256xf32>
    %129 = arith.addf %126, %128 : vector<2x256xf32>
    %c1 = arith.constant 1 : index
    %c0_50 = arith.constant 0 : index
    %130 = vector.load %arg11[%c1, %c0_50] : memref<3x256xf32, #tpu.memory_space<vmem>>, vector<1x256xf32>
    %c2 = arith.constant 2 : index
    %c0_51 = arith.constant 0 : index
    %131 = vector.load %arg11[%c2, %c0_51] : memref<3x256xf32, #tpu.memory_space<vmem>>, vector<1x256xf32>
    %cst_52 = arith.constant dense<0.000000e+00> : vector<256xf32>
    %132 = vector.multi_reduction <add>, %129, %cst_52 [0] : vector<2x256xf32> to vector<256xf32>
    %133 = vector.shape_cast %132 : vector<256xf32> to vector<1x256xf32>
    %cst_53 = arith.constant 2.000000e+00 : f32
    %134 = vector.broadcast %cst_53 : f32 to vector<1x256xf32>
    %135 = arith.divf %133, %134 : vector<1x256xf32>
    %136 = vector.broadcast %135 : vector<1x256xf32> to vector<2x256xf32>
    %137 = arith.subf %129, %136 : vector<2x256xf32>
    %138 = arith.mulf %137, %137 : vector<2x256xf32>
    %cst_54 = arith.constant dense<0.000000e+00> : vector<256xf32>
    %139 = vector.multi_reduction <add>, %138, %cst_54 [0] : vector<2x256xf32> to vector<256xf32>
    %140 = vector.shape_cast %139 : vector<256xf32> to vector<1x256xf32>
    %cst_55 = arith.constant 2.000000e+00 : f32
    %141 = vector.broadcast %cst_55 : f32 to vector<1x256xf32>
    %142 = arith.divf %140, %141 : vector<1x256xf32>
    %cst_56 = arith.constant 9.99999974E-6 : f32
    %143 = vector.broadcast %cst_56 : f32 to vector<1x256xf32>
    %144 = arith.addf %142, %143 : vector<1x256xf32>
    %145 = math.rsqrt %144 : vector<1x256xf32>
    %146 = vector.broadcast %145 : vector<1x256xf32> to vector<2x256xf32>
    %147 = arith.mulf %137, %146 : vector<2x256xf32>
    %148 = vector.broadcast %130 : vector<1x256xf32> to vector<2x256xf32>
    %149 = arith.mulf %147, %148 : vector<2x256xf32>
    %150 = vector.broadcast %131 : vector<1x256xf32> to vector<2x256xf32>
    %151 = arith.addf %149, %150 : vector<2x256xf32>
    %152 = arith.truncf %151 : vector<2x256xf32> to vector<2x256xbf16>
    %c0_57 = arith.constant 0 : index
    %c0_58 = arith.constant 0 : index
    %153 = vector.load %arg12[%c0_57, %c0_58] : memref<256x128xbf16, #tpu.memory_space<vmem>>, vector<256x128xbf16>
    %cst_59 = arith.constant dense<0.000000e+00> : vector<2x128xf32>
    %154 = tpu.matmul %152, %153, %cst_59 {dimension_numbers = #tpu.dot_dimension_numbers<[1], [0], [0], [1], [0, 0, 1, 1], [], []>} : vector<2x256xbf16>, vector<256x128xbf16>, vector<2x128xf32> -> vector<2x128xf32>
    %c0_60 = arith.constant 0 : index
    %c0_61 = arith.constant 0 : index
    %155 = vector.load %arg13[%c0_60, %c0_61] : memref<3x128xf32, #tpu.memory_space<vmem>>, vector<1x128xf32>
    %156 = vector.broadcast %155 : vector<1x128xf32> to vector<2x128xf32>
    %157 = arith.addf %154, %156 : vector<2x128xf32>
    %c1_62 = arith.constant 1 : index
    %c0_63 = arith.constant 0 : index
    %158 = vector.load %arg13[%c1_62, %c0_63] : memref<3x128xf32, #tpu.memory_space<vmem>>, vector<1x128xf32>
    %c2_64 = arith.constant 2 : index
    %c0_65 = arith.constant 0 : index
    %159 = vector.load %arg13[%c2_64, %c0_65] : memref<3x128xf32, #tpu.memory_space<vmem>>, vector<1x128xf32>
    %cst_66 = arith.constant dense<0.000000e+00> : vector<128xf32>
    %160 = vector.multi_reduction <add>, %157, %cst_66 [0] : vector<2x128xf32> to vector<128xf32>
    %161 = vector.shape_cast %160 : vector<128xf32> to vector<1x128xf32>
    %cst_67 = arith.constant 2.000000e+00 : f32
    %162 = vector.broadcast %cst_67 : f32 to vector<1x128xf32>
    %163 = arith.divf %161, %162 : vector<1x128xf32>
    %164 = vector.broadcast %163 : vector<1x128xf32> to vector<2x128xf32>
    %165 = arith.subf %157, %164 : vector<2x128xf32>
    %166 = arith.mulf %165, %165 : vector<2x128xf32>
    %cst_68 = arith.constant dense<0.000000e+00> : vector<128xf32>
    %167 = vector.multi_reduction <add>, %166, %cst_68 [0] : vector<2x128xf32> to vector<128xf32>
    %168 = vector.shape_cast %167 : vector<128xf32> to vector<1x128xf32>
    %cst_69 = arith.constant 2.000000e+00 : f32
    %169 = vector.broadcast %cst_69 : f32 to vector<1x128xf32>
    %170 = arith.divf %168, %169 : vector<1x128xf32>
    %cst_70 = arith.constant 9.99999974E-6 : f32
    %171 = vector.broadcast %cst_70 : f32 to vector<1x128xf32>
    %172 = arith.addf %170, %171 : vector<1x128xf32>
    %173 = math.rsqrt %172 : vector<1x128xf32>
    %174 = vector.broadcast %173 : vector<1x128xf32> to vector<2x128xf32>
    %175 = arith.mulf %165, %174 : vector<2x128xf32>
    %176 = vector.broadcast %158 : vector<1x128xf32> to vector<2x128xf32>
    %177 = arith.mulf %175, %176 : vector<2x128xf32>
    %178 = vector.broadcast %159 : vector<1x128xf32> to vector<2x128xf32>
    %179 = arith.addf %177, %178 : vector<2x128xf32>
    %180 = arith.truncf %179 : vector<2x128xf32> to vector<2x128xbf16>
    %c0_71 = arith.constant 0 : index
    %c0_72 = arith.constant 0 : index
    %181 = vector.load %arg14[%c0_71, %c0_72] : memref<128x128xbf16, #tpu.memory_space<vmem>>, vector<128x128xbf16>
    %cst_73 = arith.constant dense<0.000000e+00> : vector<2x128xf32>
    %182 = tpu.matmul %180, %181, %cst_73 {dimension_numbers = #tpu.dot_dimension_numbers<[1], [0], [0], [1], [0, 0, 1, 1], [], []>} : vector<2x128xbf16>, vector<128x128xbf16>, vector<2x128xf32> -> vector<2x128xf32>
    %c0_74 = arith.constant 0 : index
    %c0_75 = arith.constant 0 : index
    %183 = vector.load %arg15[%c0_74, %c0_75] : memref<1x128xf32, #tpu.memory_space<vmem>>, vector<1x128xf32>
    %184 = vector.broadcast %183 : vector<1x128xf32> to vector<2x128xf32>
    %185 = arith.addf %182, %184 : vector<2x128xf32>
    %c0_76 = arith.constant 0 : index
    %c0_77 = arith.constant 0 : index
    %186 = vector.load %arg16[%c0_76, %c0_77] : memref<2x128xf32, #tpu.memory_space<vmem>>, vector<2x128xf32>
    tpu.vector_store %arg16[%c0_76, %c0_77], %185 {strides = array<i32>} : memref<2x128xf32, #tpu.memory_space<vmem>>, vector<2x128xf32>,
    return
  }
  func.func @transform_0(%arg0: i32) -> (i32, i32) {
    %c0_i32 = arith.constant 0 : i32
    %c0_i32_0 = arith.constant 0 : i32
    %c0_i32_1 = arith.constant 0 : i32
    return %c0_i32, %c0_i32_0 : i32, i32
  }
  func.func @transform_1(%arg0: i32) -> (i32, i32) {
    %c0_i32 = arith.constant 0 : i32
    %c0_i32_0 = arith.constant 0 : i32
    %c0_i32_1 = arith.constant 0 : i32
    return %c0_i32, %c0_i32_0 : i32, i32
  }
  func.func @transform_2(%arg0: i32) -> (i32, i32) {
    %c0_i32 = arith.constant 0 : i32
    %c0_i32_0 = arith.constant 0 : i32
    %c0_i32_1 = arith.constant 0 : i32
    return %c0_i32, %c0_i32_0 : i32, i32
  }
  func.func @transform_3(%arg0: i32) -> (i32, i32) {
    %c0_i32 = arith.constant 0 : i32
    %c0_i32_0 = arith.constant 0 : i32
    %c0_i32_1 = arith.constant 0 : i32
    return %c0_i32, %c0_i32_0 : i32, i32
  }
  func.func @transform_4(%arg0: i32) -> (i32, i32) {
    %c0_i32 = arith.constant 0 : i32
    %c0_i32_0 = arith.constant 0 : i32
    %c0_i32_1 = arith.constant 0 : i32
    return %c0_i32, %c0_i32_0 : i32, i32
  }
  func.func @transform_5(%arg0: i32) -> (i32, i32) {
    %c0_i32 = arith.constant 0 : i32
    %c0_i32_0 = arith.constant 0 : i32
    %c0_i32_1 = arith.constant 0 : i32
    return %c0_i32, %c0_i32_0 : i32, i32
  }
  func.func @transform_6(%arg0: i32) -> (i32, i32) {
    %c0_i32 = arith.constant 0 : i32
    %c0_i32_0 = arith.constant 0 : i32
    %c0_i32_1 = arith.constant 0 : i32
    return %c0_i32, %c0_i32_0 : i32, i32
  }
  func.func @transform_7(%arg0: i32) -> (i32, i32) {
    %c0_i32 = arith.constant 0 : i32
    %c0_i32_0 = arith.constant 0 : i32
    %c0_i32_1 = arith.constant 0 : i32
    return %c0_i32, %c0_i32_0 : i32, i32
  }
  func.func @transform_8(%arg0: i32) -> (i32, i32) {
    %c0_i32 = arith.constant 0 : i32
    %c0_i32_0 = arith.constant 0 : i32
    %c0_i32_1 = arith.constant 0 : i32
    return %c0_i32, %c0_i32_0 : i32, i32
  }
  func.func @transform_9(%arg0: i32) -> (i32, i32) {
    %c0_i32 = arith.constant 0 : i32
    %c0_i32_0 = arith.constant 0 : i32
    %c0_i32_1 = arith.constant 0 : i32
    return %c0_i32, %c0_i32_0 : i32, i32
  }
  func.func @transform_10(%arg0: i32) -> (i32, i32) {
    %c0_i32 = arith.constant 0 : i32
    %c0_i32_0 = arith.constant 0 : i32
    %c0_i32_1 = arith.constant 0 : i32
    return %c0_i32, %c0_i32_0 : i32, i32
  }
  func.func @transform_11(%arg0: i32) -> (i32, i32) {
    %c0_i32 = arith.constant 0 : i32
    %c0_i32_0 = arith.constant 0 : i32
    %c0_i32_1 = arith.constant 0 : i32
    return %c0_i32, %c0_i32_0 : i32, i32
  }
  func.func @transform_12(%arg0: i32) -> (i32, i32) {
    %c0_i32 = arith.constant 0 : i32
    %c0_i32_0 = arith.constant 0 : i32
    %c0_i32_1 = arith.constant 0 : i32
    return %c0_i32, %c0_i32_0 : i32, i32
  }
  func.func @transform_13(%arg0: i32) -> (i32, i32) {
    %c0_i32 = arith.constant 0 : i32
    %c0_i32_0 = arith.constant 0 : i32
    %c0_i32_1 = arith.constant 0 : i32
    return %c0_i32, %c0_i32_0 : i32, i32
  }
  func.func @transform_14(%arg0: i32) -> (i32, i32) {
    %c0_i32 = arith.constant 0 : i32
    %c0_i32_0 = arith.constant 0 : i32
    %c0_i32_1 = arith.constant 0 : i32
    return %c0_i32, %c0_i32_0 : i32, i32
  }
  func.func @transform_15(%arg0: i32) -> (i32, i32) {
    %c0_i32 = arith.constant 0 : i32
    %c0_i32_0 = arith.constant 0 : i32
    %c0_i32_1 = arith.constant 0 : i32
    return %c0_i32, %c0_i32_0 : i32, i32
  }
}

</mosaic_0001>

<bundles_post_ra>
// kernel: variant2_forward.1
= control target key start
LH: loop header
LB: loop body
LE: loop exit
PB: predicated region body
PF: predicated region fallthrough
CT: control target
= control target key end

     0   :  { %20 = vsyncpa [#allocation3], 0  ;;  %s4707_s0 = inlined_call_operand.vmem [shape: bf16[48,140], index: 0, kind: input, shape index: {}]   ;;  %s4708_s1 = inlined_call_operand.vmem [shape: bf16[140,256], index: 1, kind: input, shape index: {}]   ;;  %s4709_s2 = inlined_call_operand.vmem [shape: f32[3,128], index: 2, kind: input, shape index: {}]   ;;  %s4710_s3 = inlined_call_operand.vmem [shape: f32[128,8], index: 3, kind: input, shape index: {}]   ;;  %s4711_s4 = inlined_call_operand.vmem [shape: f32[8,128], index: 4, kind: input, shape index: {}]   ;;  %s4712_s5 = inlined_call_operand.vmem [shape: bf16[640,256], index: 5, kind: input, shape index: {}]   ;;  %s4713_s6 = inlined_call_operand.vmem [shape: f32[3,128], index: 6, kind: input, shape index: {}]   ;;  %s4714_s7 = inlined_call_operand.vmem [shape: f32[128,16], index: 7, kind: input, shape index: {}]   ;;  %s4715_s8 = inlined_call_operand.vmem [shape: f32[16,128], index: 8, kind: input, shape index: {}]   ;;  %s4716_s9 = inlined_call_operand.hbm [shape: bf16[640,256], index: 9, kind: input, shape index: {}]   ;;  %s4717_s10 = inlined_call_operand.vmem [shape: f32[3,256], index: 10, kind: input, shape index: {}]   ;;  %s4718_s11 = inlined_call_operand.vmem [shape: bf16[256,128], index: 11, kind: input, shape index: {}]   ;;  %s4719_s12 = inlined_call_operand.vmem [shape: f32[3,128], index: 12, kind: input, shape index: {}]   ;;  %s4720_s13 = inlined_call_operand.vmem [shape: bf16[128,128], index: 13, kind: input, shape index: {}]   ;;  %s4721_s14 = inlined_call_operand.vmem [shape: f32[1,128], index: 14, kind: input, shape index: {}]   ;;  %s4722_s15 = inlined_call_operand.hbm [shape: f32[2,128], index: 15, kind: output, shape index: {}]  }
   0x1   :  { %21 = vsyncpa [#allocation4], 0  ;;  %s3873_s18 = smov [#allocation2]   ;;  %s3825_s22 = scalar_lea.hbm %s4716_s9, 10240 }
   0x2   :  { %s45_s19 = sshll.u32 %s3873_s18, 4  ;;  %p3826_p0 = scmp.ne.s32.totalorder %s4716_s9, %s3825_s22  ;;  %s46_s19 = int_to_ptr.vmem [resolvable:$true] %s45_s19 }
   0x3   :  { %p3829_p1 = scmp.lt.u32.totalorder %s3825_s22, %s4716_s9 }
   0x5   :  { %p3831_p2 = pnand %p3829_p1, %p3826_p0 }
   0x7   :  { %3834 = shalt.err (!%p3831_p2)
}
   0x8   :  { %s3835_s27 = scalar_lea.vmem %s46_s19, 10240  ;;  %p3840_p4 = scmp.lt.s32.totalorder %s46_s19, %s46_s19 }
   0x9   :  { %p3836_p3 = scmp.ne.s32.totalorder %s46_s19, %s3835_s27  ;;  %p3841_p5 = scmp.lt.s32.totalorder %s3835_s27, %s3835_s27 }
   0xb   :  { %p3842_p6 = por %p3841_p5, %p3840_p4 }
   0xd   :  { %p3843_p7 = pnand %p3842_p6, %p3836_p3 }
   0xf   :  { %3846 = shalt.err (!%p3843_p7)
}
  0x10   :  { %s3874_s28 = smov 128   ;;  %s3875_s29 = smov 8  }
  0x11   :  { %51 = dma.hbm_to_vmem [thread:$0]  %s4716_s9, 10240, %s46_s19, [#allocation3], %s3874_s28, %s3874_s28, %s3875_s29  }
  0x12   :  { %3869 = dma.done.wait [#allocation3], 10240  }
  0x13   :  { %3870 = vsyncadd [#allocation3], 4294957056  ;;  %v3515_v0 = vld [vmem:[%s4708_s1 + $0x4] ss:$8 sps:$4 sm:$0xff]   ;;  %v3517_v1 = vld [vmem:[%s4708_s1] ss:$8 sps:$4 sm:$0xff]   ;;  %v312_v55 = vlaneseq }
  0x14   :  { %222 = vmatprep.subr.bf16.mxu1 %v3515_v0  ;;  %v3518_v2 = vld [vmem:[%s4708_s1 + $0x14] ss:$8 sps:$4 sm:$0xff]   ;;  %v3520_v3 = vld [vmem:[%s4708_s1 + $0x10] ss:$8 sps:$4 sm:$0xff]   ;;  %v3521_v4 = vld [vmem:[%s4708_s1 + $0x24] ss:$8 sps:$4 sm:$0xff]  }
  0x15   :  { %223 = vmatpush1.bf16.msra.mxu1 %v3517_v1  ;;  %v3523_v5 = vld [vmem:[%s4708_s1 + $0x20] ss:$8 sps:$4 sm:$0xff]   ;;  %v3524_v6 = vld [vmem:[%s4708_s1 + $0x34] ss:$8 sps:$4 sm:$0xff]   ;;  %v3526_v7 = vld [vmem:[%s4708_s1 + $0x30] ss:$8 sps:$4 sm:$0xff]  }
  0x16   :  { %224 = vmatprep.subr.bf16.mxu1 %v3518_v2  ;;  %v3527_v8 = vld [vmem:[%s4708_s1 + $0x44] ss:$8 sps:$4 sm:$0xff]   ;;  %vm205_vm0 = vcmask 97280   ;;  %v3529_v10 = vld [vmem:[%s4708_s1 + $0x40] ss:$8 sps:$4 sm:$0xff]   ;;  %vm215_vm1 = vcmask 1045504  }
  0x17   :  { %v3544_v9 = vld [vmem:[%s4707_s0 + $0x4] ss:$8 sps:$4 sm:$0xff]   ;;  %v3530_v11 = vld [vmem:[%s4708_s1 + $0x54] ss:$8 sps:$4 sm:$0xff]   ;;  %v3532_v12 = vld [vmem:[%s4708_s1 + $0x50] ss:$8 sps:$4 sm:$0xff]  }
  0x18   :  { %2885 = vmatprep.mubr.msk.bf16.mxu1 %vm205_vm0, %v3544_v9  ;;  %v3533_v13 = vld [vmem:[%s4708_s1 + $0x64] ss:$8 sps:$4 sm:$0xff]   ;;  %v3535_v14 = vld [vmem:[%s4708_s1 + $0x60] ss:$8 sps:$4 sm:$0xff]   ;;  %v3536_v15 = vld [vmem:[%s4708_s1 + $0x74] ss:$8 sps:$4 sm:$0xff]  }
  0x19   :  { %225 = vmatpush1.bf16.msra.mxu1 %v3520_v3  ;;  %v3538_v16 = vld [vmem:[%s4708_s1 + $0x70] ss:$8 sps:$4 sm:$0xff]   ;;  %v3539_v17 = vld [vmem:[%s4708_s1 + $0x84] ss:$8 sps:$4 sm:$0x3f]   ;;  %v3876_v28 = vmov 0.0|0.0  }
  0x1a   :  { %226 = vmatprep.subr.bf16.mxu1 %v3521_v4  ;;  %v3541_v18 = vld [vmem:[%s4708_s1 + $0x80] ss:$8 sps:$4 sm:$0x3f]   ;;  %v3545_v21 = vld [vmem:[%s4707_s0 + $0x14] ss:$8 sps:$4 sm:$0xff]   ;;  %3402 = vmatprep.subr.bf16.mxu0 %v3876_v28  ;;  %vm3877_vm2 = vmmov 0  }
  0x1b   :  { %v217_v19 = vsel %vm215_vm1, %v3541_v18, 0  ;;  %v3542_v20 = vld [vmem:[%s4707_s0] ss:$8 sps:$4 sm:$0xff]   ;;  %v3547_v22 = vld [vmem:[%s4707_s0 + $0x10] ss:$8 sps:$4 sm:$0xff]   ;;  %v3878_v50 = vmov 0.0  }
  0x1c   :  { %v3548_v23 = vld [vmem:[%s4707_s0 + $0x24] ss:$8 sps:$4 sm:$0xff]   ;;  %v3550_v24 = vld [vmem:[%s4707_s0 + $0x20] ss:$8 sps:$4 sm:$0xff]   ;;  %v297_v29 = vld [vmem:[%s4710_s3 + $0x10] sm:$0xff]  ;;  %3266 = vmatprep.mubr.msk.f32.mxu0 %vm3877_vm2, %v3878_v50  ;;  %v4120_v58 = vshrl.u32 %v312_v55, 7 }
  0x1d   :  { %227 = vmatpush1.bf16.msra.mxu1 %v3523_v5  ;;  %v295_v25 = vld [vmem:[%s4710_s3] sm:$0xff]  ;;  %v296_v26 = vld [vmem:[%s4710_s3 + $0x8] sm:$0xff]  ;;  %v298_v30 = vld [vmem:[%s4710_s3 + $0x18] sm:$0xff]  ;;  %vm407_vm6 = vcmask 64512   ;;  %vm685_vm8 = vcmask 1043456   ;;  %vm701_vm9 = vcmask 1041408  }
  0x1e   :  { %228 = vmatprep.subr.bf16.mxu1 %v3524_v6  ;;  %v3379_v27 = vpack.c.bf16 %v296_v26, %v295_v25  ;;  %v3382_v31 = vpack.c.bf16 %v298_v30, %v297_v29  ;;  %v299_v32 = vld [vmem:[%s4710_s3 + $0x20] sm:$0xff]  ;;  %v300_v33 = vld [vmem:[%s4710_s3 + $0x28] sm:$0xff]  ;;  %v301_v35 = vld [vmem:[%s4710_s3 + $0x30] sm:$0xff]  ;;  %v4123_v63 = vsub.s32 0, %v4120_v58  ;;  %vm671_vm7 = vcmp.ge.s32.totalorder %v4120_v58, 2 }
  0x1f   :  { %v3385_v34 = vpack.c.bf16 %v300_v33, %v299_v32  ;;  %v302_v36 = vld [vmem:[%s4710_s3 + $0x38] sm:$0xff]  ;;  %v303_v38 = vld [vmem:[%s4710_s3 + $0x40] sm:$0xff]  ;;  %v304_v39 = vld [vmem:[%s4710_s3 + $0x48] sm:$0xff]  ;;  %vm3879_vm10 = vmmov 1   ;;  %vm1567_vm14 = vcmask 130048  }
  0x20   :  { %3404 = vmatpush3.bf16.msra.mxu0 %v3379_v27  ;;  %v3388_v37 = vpack.c.bf16 %v302_v36, %v301_v35  ;;  %v3391_v40 = vpack.c.bf16 %v304_v39, %v303_v38  ;;  %v305_v41 = vld [vmem:[%s4710_s3 + $0x50] sm:$0xff]  ;;  %v306_v42 = vld [vmem:[%s4710_s3 + $0x58] sm:$0xff]  ;;  %v307_v44 = vld [vmem:[%s4710_s3 + $0x60] sm:$0xff] }
  0x21   :  { %229 = vmatpush1.bf16.msra.mxu1 %v3526_v7  ;;  %3405 = vmatprep.subr.bf16.mxu0 %v3876_v28  ;;  %v3394_v43 = vpack.c.bf16 %v306_v42, %v305_v41  ;;  %v308_v45 = vld [vmem:[%s4710_s3 + $0x68] sm:$0xff]  ;;  %v309_v47 = vld [vmem:[%s4710_s3 + $0x70] sm:$0xff]  ;;  %v310_v48 = vld [vmem:[%s4710_s3 + $0x78] sm:$0xff] }
  0x22   :  { %230 = vmatprep.subr.bf16.mxu1 %v3527_v8  ;;  %v3397_v46 = vpack.c.bf16 %v308_v45, %v307_v44  ;;  %v3400_v49 = vpack.c.bf16 %v310_v48, %v309_v47  ;;  %v4128_v1 = vld [vmem:[%s4709_s2] sm:$0x7]  ;;  %v3556_v55 = vld [vmem:[%s4712_s5 + $0x14] ss:$8 sps:$4 sm:$0xff]   ;;  %vm2970_vm11 = vmpackc.low %vm3879_vm10, %vm671_vm7 }
  0x23   :  { %v315_v4 = vrot.slane %v4128_v1, %v4123_v63 }
  0x24   :  { %3407 = vmatpush3.bf16.msra.mxu0 %v3382_v31 }
  0x25   :  { %231 = vmatpush1.bf16.msra.mxu1 %v3529_v10  ;;  %3408 = vmatprep.subr.bf16.mxu0 %v3876_v28 }
  0x26   :  { %232 = vmatprep.subr.bf16.mxu1 %v3530_v11 }
  0x28   :  { %3410 = vmatpush3.bf16.msra.mxu0 %v3385_v34 }
  0x29   :  { %233 = vmatpush1.bf16.msra.mxu1 %v3532_v12  ;;  %3411 = vmatprep.subr.bf16.mxu0 %v3876_v28 }
  0x2a   :  { %234 = vmatprep.subr.bf16.mxu1 %v3533_v13 }
  0x2c   :  { %3413 = vmatpush3.bf16.msra.mxu0 %v3388_v37 }
  0x2d   :  { %235 = vmatpush1.bf16.msra.mxu1 %v3535_v14  ;;  %3414 = vmatprep.subr.bf16.mxu0 %v3876_v28 }
  0x2e   :  { %236 = vmatprep.subr.bf16.mxu1 %v3536_v15 }
  0x30   :  { %3416 = vmatpush3.bf16.msra.mxu0 %v3391_v40 }
  0x31   :  { %237 = vmatpush1.bf16.msra.mxu1 %v3538_v16  ;;  %3417 = vmatprep.subr.bf16.mxu0 %v3876_v28 }
  0x32   :  { %2884 = vmatprep.subr.msk.bf16.mxu1 %vm215_vm1, %v3539_v17 }
  0x34   :  { %3419 = vmatpush3.bf16.msra.mxu0 %v3394_v43 }
  0x35   :  { %239 = vmatpush1.bf16.msra.mxu1 %v217_v19  ;;  %3420 = vmatprep.subr.bf16.mxu0 %v3876_v28 }
  0x36   :  { %3378 = vmatprep.subr.bf16.mxu1 %v3876_v28 }
  0x38   :  { %255 = vmatmul.mubr.bf16.vlgmr.msra.gmra.mrb[0].mxu1 %v3542_v20  ;;  %3422 = vmatpush3.bf16.msra.mxu0 %v3397_v46 }
  0x39   :  { %2886 = vmatprep.mubr.msk.bf16.mxu1 %vm205_vm0, %v3545_v21  ;;  %3380 = vmatpush3.bf16.msra.mxu1 %v3379_v27 }
  0x3a   :  { %3381 = vmatprep.subr.bf16.mxu1 %v3876_v28  ;;  %3423 = vmatprep.subr.bf16.mxu0 %v3876_v28 }
  0x3c   :  { %3425 = vmatpush3.bf16.msra.mxu0 %v3400_v49 }
  0x3d   :  { %3383 = vmatpush3.bf16.msra.mxu1 %v3382_v31  ;;  %v311_v31 = vld [vmem:[%s4711_s4] sm:$0xff] }
  0x3e   :  { %3384 = vmatprep.subr.bf16.mxu1 %v3876_v28 }
  0x40   :  { %265 = vmatmul.mubr.bf16.gmra.mrb[4].mxu1 %v3547_v22 }
  0x41   :  { %2887 = vmatprep.mubr.msk.bf16.mxu1 %vm205_vm0, %v3548_v23  ;;  %3386 = vmatpush3.bf16.msra.mxu1 %v3385_v34 }
  0x42   :  { %3387 = vmatprep.subr.bf16.mxu1 %v3876_v28 }
  0x45   :  { %3389 = vmatpush3.bf16.msra.mxu1 %v3388_v37 }
  0x46   :  { %3390 = vmatprep.subr.bf16.mxu1 %v3876_v28 }
  0x48   :  { %275 = vmatmul.mubr.bf16.gmra.mrb[8].mxu1 %v3550_v24 }
  0x49   :  { %3392 = vmatpush3.bf16.msra.mxu1 %v3391_v40  ;;  %3226 = vmatprep.mubr.msk.f32.mxu1 %vm3877_vm2, %v3878_v50 }
  0x4a   :  { %3393 = vmatprep.subr.bf16.mxu1 %v3876_v28 }
  0x4d   :  { %3395 = vmatpush3.bf16.msra.mxu1 %v3394_v43 }
  0x4e   :  { %3396 = vmatprep.subr.bf16.mxu1 %v3876_v28 }
  0x51   :  { %3398 = vmatpush3.bf16.msra.mxu1 %v3397_v46 }
  0x52   :  { %3399 = vmatprep.subr.bf16.mxu1 %v3876_v28 }
  0x55   :  { %3401 = vmatpush3.bf16.msra.mxu1 %v3400_v49 }
  0x56   :  { %3229 = vmatprep.subr.mxu1 %v3878_v50 }
 0x10b   :  { %v256_v51 = vpop.f32.mrb[0].mxu1 }
 0x10c   :  { %v258_v52 = vpop.f32.mrb[1].mxu1 }
 0x10d   :  { %v285_v53 = vmax.f32 %v256_v51, %v258_v52  ;;  %v260_v54 = vpop.f32.mrb[2].mxu1 }
 0x10e   :  { %v262_v56 = vpop.f32.mrb[3].mxu1 }
 0x10f   :  { %v286_v57 = vmax.f32 %v260_v54, %v262_v56  ;;  %v3553_v54 = vld [vmem:[%s4712_s5 + $0x4] ss:$8 sps:$4 sm:$0xff]   ;;  %v3554_v56 = vld [vmem:[%s4712_s5 + $0x10] ss:$8 sps:$4 sm:$0xff]  }
 0x110   :  { %1324 = vmatprep.subr.bf16.mxu0 %v3553_v54 }
 0x113   :  { %v266_v59 = vpop.f32.mrb[4].mxu1 }
 0x114   :  { %v268_v60 = vpop.f32.mrb[5].mxu1 }
 0x115   :  { %v287_v61 = vmax.f32 %v266_v59, %v268_v60  ;;  %v270_v62 = vpop.f32.mrb[6].mxu1  ;;  %v3557_v59 = vld [vmem:[%s4712_s5 + $0x20] ss:$8 sps:$4 sm:$0xff]   ;;  %v3562_v60 = vld [vmem:[%s4712_s5 + $0x34] ss:$8 sps:$4 sm:$0xff]  }
 0x116   :  { %v272_v0 = vpop.f32.mrb[7].mxu1 }
 0x117   :  { %v288_v2 = vmax.f32 %v270_v62, %v272_v0  ;;  %v3565_v62 = vld [vmem:[%s4712_s5 + $0x44] ss:$8 sps:$4 sm:$0xff]   ;;  %v3563_v0 = vld [vmem:[%s4712_s5 + $0x40] ss:$8 sps:$4 sm:$0xff]  }
 0x119   :  { %v291_v3 = vmax.f32 %v285_v53, %v288_v2  ;;  %v3551_v53 = vld [vmem:[%s4712_s5] ss:$8 sps:$4 sm:$0xff]   ;;  %v3568_v2 = vld [vmem:[%s4712_s5 + $0x54] ss:$8 sps:$4 sm:$0xff]  }
 0x11b   :  { %v276_v5 = vpop.f32.mrb[8].mxu1  ;;  %v316_v7 = vadd.f32 %v315_v4, %v291_v3  ;;  %v3566_v3 = vld [vmem:[%s4712_s5 + $0x50] ss:$8 sps:$4 sm:$0xff]  }
 0x11c   :  { %v278_v6 = vpop.f32.mrb[9].mxu1 }
 0x11d   :  { %v289_v8 = vmax.f32 %v276_v5, %v278_v6  ;;  %v280_v9 = vpop.f32.mrb[10].mxu1  ;;  %v322_v13 = vmul.f32 0.1, %v316_v7  ;;  %vm319_vm3 = vcmp.ge.f32.partialorder %v316_v7, 0.0  ;;  %v3569_v5 = vld [vmem:[%s4712_s5 + $0x60] ss:$8 sps:$4 sm:$0xff]  }
 0x11e   :  { %v282_v10 = vpop.f32.mrb[11].mxu1  ;;  %v3574_v6 = vld [vmem:[%s4712_s5 + $0x74] ss:$8 sps:$4 sm:$0xff]  }
 0x11f   :  { %v292_v11 = vmax.f32 %v286_v57, %v289_v8  ;;  %v290_v12 = vmax.f32 %v280_v9, %v282_v10  ;;  %v4132_v18 = vsel %vm319_vm3, %v316_v7, %v322_v13  ;;  %v3559_v57 = vld [vmem:[%s4712_s5 + $0x24] ss:$8 sps:$4 sm:$0xff]   ;;  %v3572_v7 = vld [vmem:[%s4712_s5 + $0x70] ss:$8 sps:$4 sm:$0xff]   ;;  %v3575_v9 = vld [vmem:[%s4712_s5 + $0x80] ss:$8 sps:$4 sm:$0xff]  }
 0x120   :  { %v3577_v8 = vld [vmem:[%s4712_s5 + $0x84] ss:$8 sps:$4 sm:$0xff]   ;;  %v3580_v10 = vld [vmem:[%s4712_s5 + $0x94] ss:$8 sps:$4 sm:$0xff]   ;;  %v3581_v13 = vld [vmem:[%s4712_s5 + $0xa0] ss:$8 sps:$4 sm:$0xff]  }
 0x121   :  { %v317_v14 = vadd.f32 %v315_v4, %v292_v11  ;;  %v293_v15 = vmax.f32 %v287_v61, %v290_v12  ;;  %v3560_v61 = vld [vmem:[%s4712_s5 + $0x30] ss:$8 sps:$4 sm:$0xff]   ;;  %v3583_v12 = vld [vmem:[%s4712_s5 + $0xa4] ss:$8 sps:$4 sm:$0xff]  }
 0x122   :  { %v3578_v11 = vld [vmem:[%s4712_s5 + $0x90] ss:$8 sps:$4 sm:$0xff]  }
 0x123   :  { %vm320_vm4 = vcmp.ge.f32.partialorder %v317_v14, 0.0  ;;  %v323_v16 = vmul.f32 0.1, %v317_v14  ;;  %v318_v17 = vadd.f32 %v315_v4, %v293_v15  ;;  %v3571_v4 = vld [vmem:[%s4712_s5 + $0x64] ss:$8 sps:$4 sm:$0xff]  }
 0x124   :  { %v3584_v15 = vld [vmem:[%s4712_s5 + $0xb0] ss:$8 sps:$4 sm:$0xff]  }
 0x125   :  { %v4134_v19 = vsel %vm320_vm4, %v317_v14, %v323_v16  ;;  %vm321_vm5 = vcmp.ge.f32.partialorder %v318_v17, 0.0  ;;  %v324_v20 = vmul.f32 0.1, %v318_v17  ;;  %v3586_v14 = vld [vmem:[%s4712_s5 + $0xb4] ss:$8 sps:$4 sm:$0xff]  }
 0x126   :  { %v328_v21 = vadd.f32 %v4134_v19, %v4132_v18 }
 0x127   :  { %v4138_v22 = vsel %vm321_vm5, %v318_v17, %v324_v20 }
 0x128   :  { %v329_v23 = vadd.f32 %v328_v21, %v4138_v22 }
 0x12a   :  { %v330_v24 = vrot.slane %v329_v23, 4 }
 0x12c   :  { %v331_v25 = vadd.f32 %v330_v24, %v329_v23  ;;  %v3589_v24 = vld [vmem:[%s4712_s5 + $0xc4] ss:$8 sps:$4 sm:$0xff]  }
 0x12e   :  { %v332_v26 = vrot.slane %v331_v25, 2 }
 0x130   :  { %v333_v27 = vadd.f32 %v332_v26, %v331_v25  ;;  %v3587_v25 = vld [vmem:[%s4712_s5 + $0xc0] ss:$8 sps:$4 sm:$0xff]   ;;  %v3592_v26 = vld [vmem:[%s4712_s5 + $0xd4] ss:$8 sps:$4 sm:$0xff]  }
 0x132   :  { %v334_v29 = vrot.slane %v333_v27, 1 }
 0x134   :  { %v335_v30 = vadd.f32 %v334_v29, %v333_v27  ;;  %v3590_v27 = vld [vmem:[%s4712_s5 + $0xd0] ss:$8 sps:$4 sm:$0xff]   ;;  %v3595_v29 = vld [vmem:[%s4712_s5 + $0xe4] ss:$8 sps:$4 sm:$0xff]  }
 0x136   :  { %3227 = vmatmul.mubr.f32.vlgmr.msra.gmra.mrb[12].mxu1 %v335_v30  ;;  %v3593_v30 = vld [vmem:[%s4712_s5 + $0xe0] ss:$8 sps:$4 sm:$0xff]  }
 0x137   :  { %3230 = vmatpush3.msra.mxu1 %v311_v31  ;;  %3231 = vmatprep.mubr.msk.f32.mxu1 %vm3877_vm2, %v3878_v50 }
 0x138   :  { %3269 = vmatprep.subr.mxu1 %v3878_v50 }
 0x209   :  { %v402_v32 = vpop.f32.mrb[12].mxu1 }
 0x20a   :  { %v406_v33 = vmul.f32 0.0034722222, %v402_v32  ;;  %v3228_v34 = vpop.f32.mrb[13].mxu1  ;;  %v3596_v32 = vld [vmem:[%s4712_s5 + $0xf0] ss:$8 sps:$4 sm:$0xff]  }
 0x20b   :  { %v646_v34 = vrot.slane %v4128_v1, 1 }
 0x20c   :  { %3232 = vmatmul.mubr.msk.f32.vlgmr.msra.gmra.mrb[14].mxu1 %vm407_vm6, %v406_v33  ;;  %v3601_v33 = vld [vmem:[%s4712_s5 + $0x104] ss:$8 sps:$4 sm:$0xff]  }
 0x20d   :  { %3270 = vmatpush3.msra.mxu1 %v311_v31  ;;  %3271 = vmatprep.mubr.msk.f32.mxu1 %vm3877_vm2, %v3878_v50  ;;  %v3598_v31 = vld [vmem:[%s4712_s5 + $0xf4] ss:$8 sps:$4 sm:$0xff]  }
 0x20e   :  { %1193 = vmatprep.subr.bf16.mxu1 %v3553_v54 }
 0x2df   :  { %v4150_v35 = vpop.f32.mrb[14].mxu1 }
 0x2e0   :  { %v484_v36 = vrot.slane %v4150_v35, %v4123_v63  ;;  %v3233_v37 = vpop.f32.mrb[15].mxu1 }
 0x2e2   :  { %v485_v38 = vsub.f32 %v4132_v18, %v484_v36  ;;  %v486_v39 = vsub.f32 %v4134_v19, %v484_v36  ;;  %v487_v40 = vsub.f32 %v4138_v22, %v484_v36 }
 0x2e4   :  { %v488_v41 = vmul.f32 %v485_v38, %v485_v38  ;;  %v489_v42 = vmul.f32 %v486_v39, %v486_v39  ;;  %v490_v43 = vmul.f32 %v487_v40, %v487_v40 }
 0x2e6   :  { %v491_v44 = vadd.f32 %v489_v42, %v488_v41  ;;  %v663_v42 = vsub.s32 2, %v4120_v58 }
 0x2e8   :  { %v492_v45 = vadd.f32 %v491_v44, %v490_v43 }
 0x2ea   :  { %v493_v46 = vrot.slane %v492_v45, 4 }
 0x2ec   :  { %v494_v47 = vadd.f32 %v493_v46, %v492_v45 }
 0x2ee   :  { %v495_v48 = vrot.slane %v494_v47, 2 }
 0x2f0   :  { %v496_v49 = vadd.f32 %v495_v48, %v494_v47 }
 0x2f2   :  { %v497_v51 = vrot.slane %v496_v49, 1 }
 0x2f4   :  { %v498_v52 = vadd.f32 %v497_v51, %v496_v49 }
 0x2f6   :  { %3267 = vmatmul.mubr.f32.vlgmr.msra.gmra.mrb[0].mxu0 %v498_v52 }
 0x2f7   :  { %1325 = vmatpush1.bf16.msra.mxu0 %v3551_v53 }
 0x2f8   :  { %1326 = vmatprep.subr.bf16.mxu0 %v3556_v55 }
 0x2fb   :  { %1327 = vmatpush1.bf16.msra.mxu0 %v3554_v56 }
 0x2fc   :  { %1328 = vmatprep.subr.bf16.mxu0 %v3559_v57 }
 0x2ff   :  { %1329 = vmatpush1.bf16.msra.mxu0 %v3557_v59 }
 0x300   :  { %1330 = vmatprep.subr.bf16.mxu0 %v3562_v60 }
 0x303   :  { %1331 = vmatpush1.bf16.msra.mxu0 %v3560_v61 }
 0x304   :  { %1332 = vmatprep.subr.bf16.mxu0 %v3565_v62 }
 0x307   :  { %1333 = vmatpush1.bf16.msra.mxu0 %v3563_v0 }
 0x308   :  { %1334 = vmatprep.subr.bf16.mxu0 %v3568_v2 }
 0x30b   :  { %1335 = vmatpush1.bf16.msra.mxu0 %v3566_v3 }
 0x30c   :  { %1336 = vmatprep.subr.bf16.mxu0 %v3571_v4 }
 0x30f   :  { %1337 = vmatpush1.bf16.msra.mxu0 %v3569_v5 }
 0x310   :  { %1338 = vmatprep.subr.bf16.mxu0 %v3574_v6 }
 0x313   :  { %1339 = vmatpush1.bf16.msra.mxu0 %v3572_v7 }
 0x314   :  { %1340 = vmatprep.subr.bf16.mxu0 %v3577_v8 }
 0x317   :  { %1341 = vmatpush1.bf16.msra.mxu0 %v3575_v9 }
 0x318   :  { %1342 = vmatprep.subr.bf16.mxu0 %v3580_v10 }
 0x31b   :  { %1343 = vmatpush1.bf16.msra.mxu0 %v3578_v11 }
 0x31c   :  { %1344 = vmatprep.subr.bf16.mxu0 %v3583_v12 }
 0x31f   :  { %1345 = vmatpush1.bf16.msra.mxu0 %v3581_v13 }
 0x320   :  { %1346 = vmatprep.subr.bf16.mxu0 %v3586_v14 }
 0x323   :  { %1347 = vmatpush1.bf16.msra.mxu0 %v3584_v15 }
 0x324   :  { %1348 = vmatprep.subr.bf16.mxu0 %v3589_v24 }
 0x327   :  { %1349 = vmatpush1.bf16.msra.mxu0 %v3587_v25 }
 0x328   :  { %1350 = vmatprep.subr.bf16.mxu0 %v3592_v26 }
 0x32b   :  { %1351 = vmatpush1.bf16.msra.mxu0 %v3590_v27 }
 0x32c   :  { %1352 = vmatprep.subr.bf16.mxu0 %v3595_v29 }
 0x32f   :  { %1353 = vmatpush1.bf16.msra.mxu0 %v3593_v30 }
 0x330   :  { %1354 = vmatprep.subr.bf16.mxu0 %v3598_v31 }
 0x333   :  { %1355 = vmatpush1.bf16.msra.mxu0 %v3596_v32 }
 0x334   :  { %1367 = vmatprep.subr.bf16.mxu0 %v3601_v33 }
 0x3c9   :  { %v565_v16 = vpop.f32.mrb[0].mxu0 }
 0x3ca   :  { %v569_v17 = vmul.f32 0.0034722222, %v565_v16  ;;  %v3268_v20 = vpop.f32.mrb[1].mxu0  ;;  %v3617_v16 = vld [vmem:[%s4712_s5 + $0x160] ss:$8 sps:$4 sm:$0xff]  }
 0x3cb   :  { %v3620_v20 = vld [vmem:[%s4712_s5 + $0x170] ss:$8 sps:$4 sm:$0xff]  }
 0x3cc   :  { %v570_v21 = vadd.f32 1e-05, %v569_v17  ;;  %v3622_v17 = vld [vmem:[%s4712_s5 + $0x174] ss:$8 sps:$4 sm:$0xff]  }
 0x3ce   :  { %3815 = vrsqrt.f32 %v570_v21  ;;  %v3625_v21 = vld [vmem:[%s4712_s5 + $0x184] ss:$8 sps:$4 sm:$0xff]  }
 0x3d8   :  { %v3816_v23 = vpop.eup %3815 }
 0x3d9   :  { %3272 = vmatmul.mubr.msk.f32.vlgmr.msra.gmra.mrb[16].mxu1 %vm407_vm6, %v3816_v23  ;;  %v3623_v23 = vld [vmem:[%s4712_s5 + $0x180] ss:$8 sps:$4 sm:$0xff]  }
 0x3da   :  { %1194 = vmatpush1.bf16.msra.mxu1 %v3551_v53 }
 0x3db   :  { %1195 = vmatprep.subr.bf16.mxu1 %v3556_v55 }
 0x3de   :  { %1196 = vmatpush1.bf16.msra.mxu1 %v3554_v56 }
 0x3df   :  { %1197 = vmatprep.subr.bf16.mxu1 %v3559_v57 }
 0x3e2   :  { %1198 = vmatpush1.bf16.msra.mxu1 %v3557_v59 }
 0x3e3   :  { %1199 = vmatprep.subr.bf16.mxu1 %v3562_v60 }
 0x3e6   :  { %1200 = vmatpush1.bf16.msra.mxu1 %v3560_v61 }
 0x3e7   :  { %1201 = vmatprep.subr.bf16.mxu1 %v3565_v62 }
 0x3ea   :  { %1202 = vmatpush1.bf16.msra.mxu1 %v3563_v0 }
 0x3eb   :  { %1203 = vmatprep.subr.bf16.mxu1 %v3568_v2 }
 0x3ee   :  { %1204 = vmatpush1.bf16.msra.mxu1 %v3566_v3 }
 0x3ef   :  { %1205 = vmatprep.subr.bf16.mxu1 %v3571_v4 }
 0x3f2   :  { %1206 = vmatpush1.bf16.msra.mxu1 %v3569_v5  ;;  %v3604_v5 = vld [vmem:[%s4712_s5 + $0x114] ss:$8 sps:$4 sm:$0xff]  }
 0x3f3   :  { %1207 = vmatprep.subr.bf16.mxu1 %v3574_v6  ;;  %v3602_v6 = vld [vmem:[%s4712_s5 + $0x110] ss:$8 sps:$4 sm:$0xff]  }
 0x3f6   :  { %1208 = vmatpush1.bf16.msra.mxu1 %v3572_v7  ;;  %v3607_v7 = vld [vmem:[%s4712_s5 + $0x124] ss:$8 sps:$4 sm:$0xff]  }
 0x3f7   :  { %1209 = vmatprep.subr.bf16.mxu1 %v3577_v8  ;;  %v3605_v8 = vld [vmem:[%s4712_s5 + $0x120] ss:$8 sps:$4 sm:$0xff]  }
 0x3fa   :  { %1210 = vmatpush1.bf16.msra.mxu1 %v3575_v9  ;;  %v3610_v9 = vld [vmem:[%s4712_s5 + $0x134] ss:$8 sps:$4 sm:$0xff]  }
 0x3fb   :  { %1211 = vmatprep.subr.bf16.mxu1 %v3580_v10  ;;  %v3608_v10 = vld [vmem:[%s4712_s5 + $0x130] ss:$8 sps:$4 sm:$0xff]  }
 0x3fe   :  { %1212 = vmatpush1.bf16.msra.mxu1 %v3578_v11  ;;  %v3613_v11 = vld [vmem:[%s4712_s5 + $0x144] ss:$8 sps:$4 sm:$0xff]  }
 0x3ff   :  { %1213 = vmatprep.subr.bf16.mxu1 %v3583_v12  ;;  %v3611_v12 = vld [vmem:[%s4712_s5 + $0x140] ss:$8 sps:$4 sm:$0xff]  }
 0x402   :  { %1214 = vmatpush1.bf16.msra.mxu1 %v3581_v13  ;;  %v3616_v13 = vld [vmem:[%s4712_s5 + $0x154] ss:$8 sps:$4 sm:$0xff]  }
 0x403   :  { %1215 = vmatprep.subr.bf16.mxu1 %v3586_v14  ;;  %v3614_v14 = vld [vmem:[%s4712_s5 + $0x150] ss:$8 sps:$4 sm:$0xff]  }
 0x406   :  { %1216 = vmatpush1.bf16.msra.mxu1 %v3584_v15  ;;  %v3619_v15 = vld [vmem:[%s4712_s5 + $0x164] ss:$8 sps:$4 sm:$0xff]  }
 0x407   :  { %1217 = vmatprep.subr.bf16.mxu1 %v3589_v24  ;;  %v3628_v24 = vld [vmem:[%s4712_s5 + $0x194] ss:$8 sps:$4 sm:$0xff]  }
 0x40a   :  { %1218 = vmatpush1.bf16.msra.mxu1 %v3587_v25  ;;  %v3626_v25 = vld [vmem:[%s4712_s5 + $0x190] ss:$8 sps:$4 sm:$0xff]  }
 0x40b   :  { %1219 = vmatprep.subr.bf16.mxu1 %v3592_v26  ;;  %v3631_v26 = vld [vmem:[%s4712_s5 + $0x1a4] ss:$8 sps:$4 sm:$0xff]  }
 0x40e   :  { %1220 = vmatpush1.bf16.msra.mxu1 %v3590_v27  ;;  %v3629_v27 = vld [vmem:[%s4712_s5 + $0x1a0] ss:$8 sps:$4 sm:$0xff]  }
 0x40f   :  { %1221 = vmatprep.subr.bf16.mxu1 %v3595_v29  ;;  %v3634_v29 = vld [vmem:[%s4712_s5 + $0x1b4] ss:$8 sps:$4 sm:$0xff]  }
 0x412   :  { %1222 = vmatpush1.bf16.msra.mxu1 %v3593_v30  ;;  %v3632_v30 = vld [vmem:[%s4712_s5 + $0x1b0] ss:$8 sps:$4 sm:$0xff]  }
 0x413   :  { %1223 = vmatprep.subr.bf16.mxu1 %v3598_v31  ;;  %v3637_v31 = vld [vmem:[%s4712_s5 + $0x1c4] ss:$8 sps:$4 sm:$0xff]  }
 0x416   :  { %1224 = vmatpush1.bf16.msra.mxu1 %v3596_v32  ;;  %v3635_v32 = vld [vmem:[%s4712_s5 + $0x1c0] ss:$8 sps:$4 sm:$0xff]  }
 0x417   :  { %1236 = vmatprep.subr.bf16.mxu1 %v3601_v33  ;;  %v3640_v33 = vld [vmem:[%s4712_s5 + $0x1d4] ss:$8 sps:$4 sm:$0xff]  }
 0x4ac   :  { %v641_v36 = vpop.f32.mrb[16].mxu1 }
 0x4ad   :  { %v648_v37 = vmul.f32 %v646_v34, %v641_v36  ;;  %v3273_v38 = vpop.f32.mrb[17].mxu1  ;;  %v3638_v34 = vld [vmem:[%s4712_s5 + $0x1d0] ss:$8 sps:$4 sm:$0xff]   ;;  %v3643_v36 = vld [vmem:[%s4712_s5 + $0x1e4] ss:$8 sps:$4 sm:$0xff]  }
 0x4ae   :  { %v3646_v38 = vld [vmem:[%s4712_s5 + $0x1f4] ss:$8 sps:$4 sm:$0xff]  }
 0x4af   :  { %v649_v39 = vmul.f32 %v648_v37, %v4150_v35  ;;  %v657_v41 = vrot.slane %v648_v37, %v4123_v63  ;;  %v3641_v37 = vld [vmem:[%s4712_s5 + $0x1e0] ss:$8 sps:$4 sm:$0xff]  }
 0x4b1   :  { %v651_v40 = vrot.slane %v649_v39, 6  ;;  %v658_v44 = vmul.f32 %v657_v41, %v4132_v18  ;;  %v659_v45 = vmul.f32 %v657_v41, %v4134_v19  ;;  %v660_v46 = vmul.f32 %v657_v41, %v4138_v22  ;;  %v3599_v22 = vld [vmem:[%s4712_s5 + $0x100] ss:$8 sps:$4 sm:$0xff]   ;;  %v3644_v39 = vld [vmem:[%s4712_s5 + $0x1f0] ss:$8 sps:$4 sm:$0xff]  }
 0x4b2   :  { %v3647_v41 = vld [vmem:[%s4712_s5 + $0x200] ss:$8 sps:$4 sm:$0xff]  }
 0x4b3   :  { %v653_v43 = vsub.f32 %v4128_v1, %v651_v40  ;;  %v3649_v40 = vld [vmem:[%s4712_s5 + $0x204] ss:$8 sps:$4 sm:$0xff]  }
 0x4b5   :  { %v664_v47 = vrot.slane %v653_v43, %v663_v42  ;;  %v3652_v43 = vld [vmem:[%s4712_s5 + $0x214] ss:$8 sps:$4 sm:$0xff]  }
 0x4b7   :  { %v666_v48 = vadd.f32 %v664_v47, %v659_v45  ;;  %v667_v49 = vadd.f32 %v664_v47, %v660_v46  ;;  %v665_v51 = vadd.f32 %v664_v47, %v658_v44  ;;  %v3650_v44 = vld [vmem:[%s4712_s5 + $0x210] ss:$8 sps:$4 sm:$0xff]   ;;  %v3880_v45 = vmov 0   ;;  %v3655_v46 = vld [vmem:[%s4712_s5 + $0x224] ss:$8 sps:$4 sm:$0xff]  }
 0x4b8   :  { %v3653_v47 = vld [vmem:[%s4712_s5 + $0x220] ss:$8 sps:$4 sm:$0xff]  }
 0x4b9   :  { %v675_v35 = vrot.slane %v666_v48, 2  ;;  %v676_v52 = vrot.slane %v667_v49, 2  ;;  %v708_v53 = vpack.c.bf16 %v666_v48, %v665_v51  ;;  %v687_v1 = vrot.slane %v666_v48, 4 }
 0x4ba   :  { %v693_v54 = vrot.slane %v667_v49, 4  ;;  %v697_v18 = vrot.slane %v665_v51, 2  ;;  %v702_v55 = vrot.slane %v666_v48, 6  ;;  %v703_v19 = vrot.slane %v667_v49, 6  ;;  %v3658_v48 = vld [vmem:[%s4712_s5 + $0x234] ss:$8 sps:$4 sm:$0xff]  }
 0x4bb   :  { %1225 = vmatprep.mubr.bf16.mxu1 %v708_v53  ;;  %v677_v56 = vsel %vm215_vm1, %v675_v35, %v676_v52  ;;  %v686_v57 = vrot.slane %v665_v51, 4  ;;  %v3656_v49 = vld [vmem:[%s4712_s5 + $0x230] ss:$8 sps:$4 sm:$0xff]   ;;  %v3661_v51 = vld [vmem:[%s4712_s5 + $0x244] ss:$8 sps:$4 sm:$0xff]  }
 0x4bc   :  { %v2971_v59 = vpack.c.bf16 %v676_v52, %v677_v56  ;;  %v694_v60 = vsel %vm685_vm8, %v687_v1, %v693_v54  ;;  %v698_v61 = vsel %vm215_vm1, %v697_v18, %v675_v35  ;;  %v704_v62 = vsel %vm701_vm9, %v702_v55, %v703_v19  ;;  %v3664_v52 = vld [vmem:[%s4712_s5 + $0x254] ss:$8 sps:$4 sm:$0xff]   ;;  %v3668_v55 = vld [vmem:[%s4712_s5 + $0x270] ss:$8 sps:$4 sm:$0xff]  }
 0x4bd   :  { %v4277_v0 = vpack.c.bf16 %v693_v54, %v694_v60  ;;  %v4279_v2 = vpack.c.bf16 %v675_v35, %v698_v61  ;;  %v4281_v3 = vpack.c.bf16 %v703_v19, %v704_v62  ;;  %v4284_v4 = vsel %vm685_vm8, %v686_v57, %v687_v1  ;;  %v3659_v35 = vld [vmem:[%s4712_s5 + $0x240] ss:$8 sps:$4 sm:$0xff]   ;;  %v3667_v1 = vld [vmem:[%s4712_s5 + $0x264] ss:$8 sps:$4 sm:$0xff]   ;;  %v3670_v18 = vld [vmem:[%s4712_s5 + $0x274] ss:$8 sps:$4 sm:$0xff]  }
 0x4be   :  { %2972 = vmatmul.mubr.msk.bf16.vlgmr.msra.gmra.mrb[20].mxu1 %vm2970_vm11, %v2971_v59  ;;  %v3665_v54 = vld [vmem:[%s4712_s5 + $0x260] ss:$8 sps:$4 sm:$0xff]   ;;  %v712_v57 = vpack.c.bf16 %v3878_v50, %v4284_v4  ;;  %v1460_v59 = vld [vmem:[%s4714_s7 + $0x10] sm:$0xff]  ;;  %v1461_v60 = vld [vmem:[%s4714_s7 + $0x18] sm:$0xff] }
 0x4bf   :  { %1237 = vmatpush1.bf16.msra.mxu1 %v3599_v22  ;;  %1356 = vmatprep.mubr.bf16.mxu0 %v4277_v0  ;;  %v1458_v19 = vld [vmem:[%s4714_s7] sm:$0xff]  ;;  %v4456_v61 = vpack.c.bf16 %v1461_v60, %v1460_v59  ;;  %v1465_v4 = vld [vmem:[%s4714_s7 + $0x38] sm:$0xff] }
 0x4c0   :  { %1268 = vmatprep.mubr.bf16.mxu1 %v4279_v2  ;;  %1357 = vmatmul.mubr.bf16.vlgmr.msra.gmra.mrb[4].mxu0 %v708_v53  ;;  %v3662_v53 = vld [vmem:[%s4712_s5 + $0x250] ss:$8 sps:$4 sm:$0xff]   ;;  %v1462_v62 = vld [vmem:[%s4714_s7 + $0x20] sm:$0xff] }
 0x4c1   :  { %1368 = vmatpush1.bf16.msra.mxu0 %v3599_v22  ;;  %1399 = vmatprep.mubr.bf16.mxu0 %v4281_v3  ;;  %v1459_v22 = vld [vmem:[%s4714_s7 + $0x8] sm:$0xff] }
 0x4c2   :  { %1238 = vmatprep.subr.bf16.mxu1 %v3604_v5  ;;  %1369 = vmatprep.subr.bf16.mxu0 %v3604_v5  ;;  %v4437_v56 = vpack.c.bf16 %v1459_v22, %v1458_v19 }
 0x4c3   :  { %1239 = vmatpush1.bf16.msra.mxu1 %v3602_v6 }
 0x4c4   :  { %1240 = vmatprep.subr.bf16.mxu1 %v3607_v7 }
 0x4c5   :  { %1370 = vmatpush1.bf16.msra.mxu0 %v3602_v6  ;;  %v1466_v6 = vld [vmem:[%s4714_s7 + $0x40] sm:$0xff] }
 0x4c6   :  { %1371 = vmatprep.subr.bf16.mxu0 %v3607_v7  ;;  %v1467_v7 = vld [vmem:[%s4714_s7 + $0x48] sm:$0xff] }
 0x4c7   :  { %1241 = vmatpush1.bf16.msra.mxu1 %v3605_v8 }
 0x4c8   :  { %1242 = vmatprep.subr.bf16.mxu1 %v3610_v9 }
 0x4c9   :  { %1372 = vmatpush1.bf16.msra.mxu0 %v3605_v8  ;;  %v4486_v8 = vpack.c.bf16 %v1467_v7, %v1466_v6 }
 0x4ca   :  { %1373 = vmatprep.subr.bf16.mxu0 %v3610_v9  ;;  %v1468_v9 = vld [vmem:[%s4714_s7 + $0x50] sm:$0xff] }
 0x4cb   :  { %1243 = vmatpush1.bf16.msra.mxu1 %v3608_v10 }
 0x4cc   :  { %1244 = vmatprep.subr.bf16.mxu1 %v3613_v11 }
 0x4cd   :  { %1374 = vmatpush1.bf16.msra.mxu0 %v3608_v10  ;;  %v1469_v10 = vld [vmem:[%s4714_s7 + $0x58] sm:$0xff] }
 0x4ce   :  { %1375 = vmatprep.subr.bf16.mxu0 %v3613_v11  ;;  %v1470_v11 = vld [vmem:[%s4714_s7 + $0x60] sm:$0xff] }
 0x4cf   :  { %1245 = vmatpush1.bf16.msra.mxu1 %v3611_v12 }
 0x4d0   :  { %1246 = vmatprep.subr.bf16.mxu1 %v3616_v13 }
 0x4d1   :  { %1376 = vmatpush1.bf16.msra.mxu0 %v3611_v12  ;;  %v3442_v12 = vpack.c.bf16 %v1469_v10, %v1468_v9  ;;  %v3673_v10 = vld [vmem:[#allocation2 + $0x4] ss:$8 sps:$4 sm:$0xff]  }
 0x4d2   :  { %1377 = vmatprep.subr.bf16.mxu0 %v3616_v13  ;;  %v1471_v13 = vld [vmem:[%s4714_s7 + $0x68] sm:$0xff] }
 0x4d3   :  { %1247 = vmatpush1.bf16.msra.mxu1 %v3614_v14 }
 0x4d4   :  { %1248 = vmatprep.subr.bf16.mxu1 %v3619_v15 }
 0x4d5   :  { %1378 = vmatpush1.bf16.msra.mxu0 %v3614_v14  ;;  %v3445_v14 = vpack.c.bf16 %v1471_v13, %v1470_v11 }
 0x4d6   :  { %1379 = vmatprep.subr.bf16.mxu0 %v3619_v15  ;;  %v1472_v15 = vld [vmem:[%s4714_s7 + $0x70] sm:$0xff] }
 0x4d7   :  { %1249 = vmatpush1.bf16.msra.mxu1 %v3617_v16 }
 0x4d8   :  { %1250 = vmatprep.subr.bf16.mxu1 %v3622_v17 }
 0x4d9   :  { %1380 = vmatpush1.bf16.msra.mxu0 %v3617_v16  ;;  %v1473_v16 = vld [vmem:[%s4714_s7 + $0x78] sm:$0xff] }
 0x4da   :  { %1381 = vmatprep.subr.bf16.mxu0 %v3622_v17  ;;  %v3448_v17 = vpack.c.bf16 %v1473_v16, %v1472_v15  ;;  %v3671_v15 = vld [vmem:[#allocation2] ss:$8 sps:$4 sm:$0xff]   ;;  %v3676_v16 = vld [vmem:[#allocation2 + $0x14] ss:$8 sps:$4 sm:$0xff]  }
 0x4db   :  { %1251 = vmatpush1.bf16.msra.mxu1 %v3620_v20 }
 0x4dc   :  { %1252 = vmatprep.subr.bf16.mxu1 %v3625_v21 }
 0x4dd   :  { %1382 = vmatpush1.bf16.msra.mxu0 %v3620_v20  ;;  %v1474_v20 = vld [vmem:[%s4715_s8] sm:$0xff] }
 0x4de   :  { %1383 = vmatprep.subr.bf16.mxu0 %v3625_v21  ;;  %v1475_v21 = vld [vmem:[%s4715_s8 + $0x8] sm:$0xff] }
 0x4df   :  { %1253 = vmatpush1.bf16.msra.mxu1 %v3623_v23 }
 0x4e0   :  { %1254 = vmatprep.subr.bf16.mxu1 %v3628_v24 }
 0x4e1   :  { %1384 = vmatpush1.bf16.msra.mxu0 %v3623_v23  ;;  %v3451_v23 = vpack.c.bf16 %v1475_v21, %v1474_v20  ;;  %v3674_v20 = vld [vmem:[#allocation2 + $0x10] ss:$8 sps:$4 sm:$0xff]   ;;  %v3679_v21 = vld [vmem:[#allocation2 + $0x24] ss:$8 sps:$4 sm:$0xff]  }
 0x4e2   :  { %1385 = vmatprep.subr.bf16.mxu0 %v3628_v24 }
 0x4e3   :  { %1255 = vmatpush1.bf16.msra.mxu1 %v3626_v25 }
 0x4e4   :  { %1256 = vmatprep.subr.bf16.mxu1 %v3631_v26 }
 0x4e5   :  { %1386 = vmatpush1.bf16.msra.mxu0 %v3626_v25 }
 0x4e6   :  { %1387 = vmatprep.subr.bf16.mxu0 %v3631_v26  ;;  %v4521_v26 = vld [vmem:[%s4713_s6] sm:$0x7] }
 0x4e7   :  { %1257 = vmatpush1.bf16.msra.mxu1 %v3629_v27 }
 0x4e8   :  { %1258 = vmatprep.subr.bf16.mxu1 %v3634_v29 }
 0x4e9   :  { %1388 = vmatpush1.bf16.msra.mxu0 %v3629_v27 }
 0x4ea   :  { %1389 = vmatprep.subr.bf16.mxu0 %v3634_v29 }
 0x4eb   :  { %1259 = vmatpush1.bf16.msra.mxu1 %v3632_v30 }
 0x4ec   :  { %1260 = vmatprep.subr.bf16.mxu1 %v3637_v31 }
 0x4ed   :  { %1390 = vmatpush1.bf16.msra.mxu0 %v3632_v30 }
 0x4ee   :  { %1391 = vmatprep.subr.bf16.mxu0 %v3637_v31 }
 0x4ef   :  { %1261 = vmatpush1.bf16.msra.mxu1 %v3635_v32 }
 0x4f0   :  { %1262 = vmatprep.subr.bf16.mxu1 %v3640_v33 }
 0x4f1   :  { %1392 = vmatpush1.bf16.msra.mxu0 %v3635_v32 }
 0x4f2   :  { %1393 = vmatprep.subr.bf16.mxu0 %v3640_v33 }
 0x4f3   :  { %1263 = vmatpush1.bf16.msra.mxu1 %v3638_v34 }
 0x4f4   :  { %1264 = vmatprep.subr.bf16.mxu1 %v3643_v36 }
 0x4f5   :  { %1394 = vmatpush1.bf16.msra.mxu0 %v3638_v34  ;;  %v1479_v34 = vrot.slane %v4521_v26, %v4123_v63 }
 0x4f6   :  { %1395 = vmatprep.subr.bf16.mxu0 %v3643_v36 }
 0x4f7   :  { %1265 = vmatpush1.bf16.msra.mxu1 %v3641_v37 }
 0x4f8   :  { %1266 = vmatprep.subr.bf16.mxu1 %v3646_v38 }
 0x4f9   :  { %1396 = vmatpush1.bf16.msra.mxu0 %v3641_v37 }
 0x4fa   :  { %1397 = vmatprep.subr.bf16.mxu0 %v3646_v38 }
 0x4fb   :  { %1267 = vmatpush1.bf16.msra.mxu1 %v3644_v39 }
 0x4fc   :  { %1279 = vmatprep.subr.bf16.mxu1 %v3649_v40 }
 0x4fd   :  { %1398 = vmatpush1.bf16.msra.mxu0 %v3644_v39 }
 0x4fe   :  { %1269 = vmatmul.mubr.bf16.vlgmr.msra.gmra.mrb[20].mxu1 %v4277_v0  ;;  %1410 = vmatprep.subr.bf16.mxu0 %v3649_v40  ;;  %v1463_v0 = vld [vmem:[%s4714_s7 + $0x28] sm:$0xff] }
 0x4ff   :  { %1280 = vmatpush1.bf16.msra.mxu1 %v3647_v41  ;;  %1311 = vmatprep.mubr.bf16.mxu1 %v3880_v45 }
 0x500   :  { %1400 = vmatmul.mubr.bf16.vlgmr.msra.gmra.mrb[4].mxu0 %v4279_v2  ;;  %1281 = vmatprep.subr.bf16.mxu1 %v3652_v43  ;;  %v4466_v2 = vpack.c.bf16 %v1463_v0, %v1462_v62 }
 0x501   :  { %1411 = vmatpush1.bf16.msra.mxu0 %v3647_v41  ;;  %1442 = vmatprep.mubr.bf16.mxu0 %v3880_v45 }
 0x502   :  { %1412 = vmatprep.subr.bf16.mxu0 %v3652_v43 }
 0x503   :  { %1282 = vmatpush1.bf16.msra.mxu1 %v3650_v44 }
 0x504   :  { %1283 = vmatprep.subr.bf16.mxu1 %v3655_v46 }
 0x505   :  { %1413 = vmatpush1.bf16.msra.mxu0 %v3650_v44 }
 0x506   :  { %1414 = vmatprep.subr.bf16.mxu0 %v3655_v46 }
 0x507   :  { %1284 = vmatpush1.bf16.msra.mxu1 %v3653_v47 }
 0x508   :  { %1285 = vmatprep.subr.bf16.mxu1 %v3658_v48 }
 0x509   :  { %1415 = vmatpush1.bf16.msra.mxu0 %v3653_v47 }
 0x50a   :  { %1416 = vmatprep.subr.bf16.mxu0 %v3658_v48 }
 0x50b   :  { %1286 = vmatpush1.bf16.msra.mxu1 %v3656_v49 }
 0x50c   :  { %1287 = vmatprep.subr.bf16.mxu1 %v3661_v51 }
 0x50d   :  { %1417 = vmatpush1.bf16.msra.mxu0 %v3656_v49 }
 0x50e   :  { %1418 = vmatprep.subr.bf16.mxu0 %v3661_v51 }
 0x50f   :  { %1288 = vmatpush1.bf16.msra.mxu1 %v3659_v35 }
 0x510   :  { %1289 = vmatprep.subr.bf16.mxu1 %v3664_v52 }
 0x511   :  { %1419 = vmatpush1.bf16.msra.mxu0 %v3659_v35 }
 0x512   :  { %1420 = vmatprep.subr.bf16.mxu0 %v3664_v52 }
 0x513   :  { %1290 = vmatpush1.bf16.msra.mxu1 %v3662_v53 }
 0x514   :  { %1291 = vmatprep.subr.bf16.mxu1 %v3667_v1 }
 0x515   :  { %1421 = vmatpush1.bf16.msra.mxu0 %v3662_v53 }
 0x516   :  { %1422 = vmatprep.subr.bf16.mxu0 %v3667_v1 }
 0x517   :  { %1292 = vmatpush1.bf16.msra.mxu1 %v3665_v54 }
 0x518   :  { %1293 = vmatprep.subr.bf16.mxu1 %v3670_v18 }
 0x519   :  { %1423 = vmatpush1.bf16.msra.mxu0 %v3665_v54 }
 0x51a   :  { %1424 = vmatprep.subr.bf16.mxu0 %v3670_v18 }
 0x51b   :  { %1294 = vmatpush1.bf16.msra.mxu1 %v3668_v55 }
 0x51c   :  { %3426 = vmatprep.subr.bf16.mxu1 %v3876_v28 }
 0x51d   :  { %1425 = vmatpush1.bf16.msra.mxu0 %v3668_v55 }
 0x51e   :  { %1312 = vmatmul.mubr.bf16.vlgmr.msra.gmra.mrb[20].mxu1 %v4281_v3  ;;  %3450 = vmatprep.subr.bf16.mxu0 %v3876_v28  ;;  %v1464_v3 = vld [vmem:[%s4714_s7 + $0x30] sm:$0xff] }
 0x51f   :  { %3428 = vmatpush3.bf16.msra.mxu1 %v4437_v56  ;;  %3306 = vmatprep.mubr.msk.f32.mxu1 %vm3877_vm2, %v3878_v50  ;;  %v4476_v5 = vpack.c.bf16 %v1465_v4, %v1464_v3 }
 0x520   :  { %1443 = vmatmul.mubr.bf16.vlgmr.msra.gmra.mrb[4].mxu0 %v712_v57  ;;  %3429 = vmatprep.subr.bf16.mxu1 %v3876_v28 }
 0x521   :  { %3313 = vmatprep.mubr.msk.f32.mxu0 %vm3877_vm2, %v3878_v50  ;;  %3452 = vmatpush3.bf16.msra.mxu0 %v3451_v23 }
 0x522   :  { %3477 = vmatprep.subr.bf16.mxu0 %v3876_v28 }
 0x523   :  { %3431 = vmatpush3.bf16.msra.mxu1 %v4456_v61 }
 0x524   :  { %3432 = vmatprep.subr.bf16.mxu1 %v3876_v28 }
 0x527   :  { %3434 = vmatpush3.bf16.msra.mxu1 %v4466_v2 }
 0x528   :  { %3435 = vmatprep.subr.bf16.mxu1 %v3876_v28 }
 0x52b   :  { %3437 = vmatpush3.bf16.msra.mxu1 %v4476_v5 }
 0x52c   :  { %3438 = vmatprep.subr.bf16.mxu1 %v3876_v28 }
 0x52f   :  { %3440 = vmatpush3.bf16.msra.mxu1 %v4486_v8 }
 0x530   :  { %3441 = vmatprep.subr.bf16.mxu1 %v3876_v28 }
 0x533   :  { %3443 = vmatpush3.bf16.msra.mxu1 %v3442_v12 }
 0x534   :  { %3444 = vmatprep.subr.bf16.mxu1 %v3876_v28 }
 0x537   :  { %3446 = vmatpush3.bf16.msra.mxu1 %v3445_v14 }
 0x538   :  { %3447 = vmatprep.subr.bf16.mxu1 %v3876_v28 }
 0x53b   :  { %3449 = vmatpush3.bf16.msra.mxu1 %v3448_v17 }
 0x53c   :  { %3453 = vmatprep.subr.bf16.mxu1 %v3876_v28 }
 0x5f1   :  { %v1313_v24 = vpop.f32.mrb[20].mxu1 }
 0x5f2   :  { %v1315_v25 = vpop.f32.mrb[21].mxu1 }
 0x5f3   :  { %v1322_v27 = vmax.f32 %v1313_v24, %v1315_v25  ;;  %v1444_v29 = vpop.f32.mrb[4].mxu0  ;;  %v1317_v30 = vpop.f32.mrb[22].mxu1  ;;  %v3682_v24 = vld [vmem:[#allocation2 + $0x34] ss:$8 sps:$4 sm:$0xff]   ;;  %v3680_v25 = vld [vmem:[#allocation2 + $0x30] ss:$8 sps:$4 sm:$0xff]  }
 0x5f4   :  { %v1446_v31 = vpop.f32.mrb[5].mxu0  ;;  %v1319_v32 = vpop.f32.mrb[23].mxu1 }
 0x5f5   :  { %v1453_v33 = vmax.f32 %v1444_v29, %v1446_v31  ;;  %v1323_v36 = vmax.f32 %v1317_v30, %v1319_v32  ;;  %v1448_v37 = vpop.f32.mrb[6].mxu0  ;;  %v3683_v29 = vld [vmem:[#allocation2 + $0x40] ss:$8 sps:$4 sm:$0xff]   ;;  %v3688_v30 = vld [vmem:[#allocation2 + $0x54] ss:$8 sps:$4 sm:$0xff]  }
 0x5f6   :  { %v1450_v38 = vpop.f32.mrb[7].mxu0  ;;  %v3686_v31 = vld [vmem:[#allocation2 + $0x50] ss:$8 sps:$4 sm:$0xff]   ;;  %v3691_v32 = vld [vmem:[#allocation2 + $0x64] ss:$8 sps:$4 sm:$0xff]  }
 0x5f7   :  { %v1455_v39 = vmax.f32 %v1322_v27, %v1453_v33  ;;  %v1454_v40 = vmax.f32 %v1448_v37, %v1450_v38  ;;  %v3685_v27 = vld [vmem:[#allocation2 + $0x44] ss:$8 sps:$4 sm:$0xff]   ;;  %v3689_v33 = vld [vmem:[#allocation2 + $0x60] ss:$8 sps:$4 sm:$0xff]  }
 0x5f8   :  { %v3697_v37 = vld [vmem:[#allocation2 + $0x84] ss:$8 sps:$4 sm:$0xff]   ;;  %v3695_v38 = vld [vmem:[#allocation2 + $0x80] ss:$8 sps:$4 sm:$0xff]  }
 0x5f9   :  { %v1480_v41 = vadd.f32 %v1479_v34, %v1455_v39  ;;  %v1456_v43 = vmax.f32 %v1323_v36, %v1454_v40  ;;  %v3692_v36 = vld [vmem:[#allocation2 + $0x70] ss:$8 sps:$4 sm:$0xff]   ;;  %v3700_v39 = vld [vmem:[#allocation2 + $0x94] ss:$8 sps:$4 sm:$0xff]  }
 0x5fa   :  { %v3698_v40 = vld [vmem:[#allocation2 + $0x90] ss:$8 sps:$4 sm:$0xff]  }
 0x5fb   :  { %v1481_v44 = vadd.f32 %v1479_v34, %v1456_v43  ;;  %v1484_v46 = vmul.f32 0.1, %v1480_v41  ;;  %vm1482_vm12 = vcmp.ge.f32.partialorder %v1480_v41, 0.0  ;;  %v3694_v34 = vld [vmem:[#allocation2 + $0x74] ss:$8 sps:$4 sm:$0xff]  }
 0x5fc   :  { %v3701_v43 = vld [vmem:[#allocation2 + $0xa0] ss:$8 sps:$4 sm:$0xff]  }
 0x5fd   :  { %vm1483_vm13 = vcmp.ge.f32.partialorder %v1481_v44, 0.0  ;;  %v1485_v47 = vmul.f32 0.1, %v1481_v44  ;;  %v4527_v49 = vsel %vm1482_vm12, %v1480_v41, %v1484_v46  ;;  %v3703_v41 = vld [vmem:[#allocation2 + $0xa4] ss:$8 sps:$4 sm:$0xff]  }
 0x5fe   :  { %v3704_v46 = vld [vmem:[#allocation2 + $0xb0] ss:$8 sps:$4 sm:$0xff]  }
 0x5ff   :  { %v4525_v48 = vsel %vm1483_vm13, %v1481_v44, %v1485_v47  ;;  %v3706_v44 = vld [vmem:[#allocation2 + $0xb4] ss:$8 sps:$4 sm:$0xff]   ;;  %v3709_v47 = vld [vmem:[#allocation2 + $0xc4] ss:$8 sps:$4 sm:$0xff]  }
 0x600   :  { %v1488_v51 = vsel %vm701_vm9, %v4525_v48, 0.0 }
 0x601   :  { %v1489_v35 = vadd.f32 %v1488_v51, %v4527_v49  ;;  %v3707_v51 = vld [vmem:[#allocation2 + $0xc0] ss:$8 sps:$4 sm:$0xff]  }
 0x603   :  { %v1490_v52 = vrot.slane %v1489_v35, 4 }
 0x605   :  { %v1491_v53 = vadd.f32 %v1490_v52, %v1489_v35  ;;  %v3712_v35 = vld [vmem:[#allocation2 + $0xd4] ss:$8 sps:$4 sm:$0xff]   ;;  %v3710_v52 = vld [vmem:[#allocation2 + $0xd0] ss:$8 sps:$4 sm:$0xff]  }
 0x607   :  { %v1492_v1 = vrot.slane %v1491_v53, 2 }
 0x609   :  { %v1493_v54 = vadd.f32 %v1492_v1, %v1491_v53  ;;  %v3715_v53 = vld [vmem:[#allocation2 + $0xe4] ss:$8 sps:$4 sm:$0xff]   ;;  %v3713_v1 = vld [vmem:[#allocation2 + $0xe0] ss:$8 sps:$4 sm:$0xff]  }
 0x60b   :  { %v1494_v18 = vrot.slane %v1493_v54, 1 }
 0x60d   :  { %v1495_v55 = vadd.f32 %v1494_v18, %v1493_v54  ;;  %v3718_v54 = vld [vmem:[#allocation2 + $0xf4] ss:$8 sps:$4 sm:$0xff]   ;;  %v3716_v18 = vld [vmem:[#allocation2 + $0xf0] ss:$8 sps:$4 sm:$0xff]  }
 0x60f   :  { %3307 = vmatmul.mubr.f32.vlgmr.msra.gmra.mrb[18].mxu1 %v1495_v55  ;;  %v3721_v55 = vld [vmem:[#allocation2 + $0x104] ss:$8 sps:$4 sm:$0xff]  }
 0x610   :  { %3455 = vmatpush3.bf16.msra.mxu1 %v4437_v56  ;;  %3348 = vmatprep.mubr.msk.f32.mxu1 %vm3877_vm2, %v3878_v50 }
 0x611   :  { %3456 = vmatprep.subr.bf16.mxu1 %v3876_v28 }
 0x614   :  { %3458 = vmatpush3.bf16.msra.mxu1 %v4456_v61 }
 0x615   :  { %3459 = vmatprep.subr.bf16.mxu1 %v3876_v28 }
 0x618   :  { %3461 = vmatpush3.bf16.msra.mxu1 %v4466_v2 }
 0x619   :  { %3462 = vmatprep.subr.bf16.mxu1 %v3876_v28 }
 0x61c   :  { %3464 = vmatpush3.bf16.msra.mxu1 %v4476_v5 }
 0x61d   :  { %3465 = vmatprep.subr.bf16.mxu1 %v3876_v28 }
 0x620   :  { %3467 = vmatpush3.bf16.msra.mxu1 %v4486_v8 }
 0x621   :  { %3468 = vmatprep.subr.bf16.mxu1 %v3876_v28 }
 0x624   :  { %3470 = vmatpush3.bf16.msra.mxu1 %v3442_v12 }
 0x625   :  { %3471 = vmatprep.subr.bf16.mxu1 %v3876_v28 }
 0x628   :  { %3473 = vmatpush3.bf16.msra.mxu1 %v3445_v14 }
 0x629   :  { %3474 = vmatprep.subr.bf16.mxu1 %v3876_v28 }
 0x62c   :  { %3476 = vmatpush3.bf16.msra.mxu1 %v3448_v17 }
 0x6e2   :  { %v1562_v19 = vpop.f32.mrb[18].mxu1 }
 0x6e3   :  { %v1566_v22 = vmul.f32 0.02, %v1562_v19  ;;  %v3308_v56 = vpop.f32.mrb[19].mxu1  ;;  %v1804_v19 = vrot.slane %v4521_v26, 1 }
 0x6e5   :  { %3314 = vmatmul.mubr.msk.f32.vlgmr.msra.gmra.mrb[2].mxu0 %vm1567_vm14, %v1566_v22 }
 0x6e6   :  { %3479 = vmatpush3.bf16.msra.mxu0 %v3451_v23  ;;  %3355 = vmatprep.mubr.msk.f32.mxu0 %vm3877_vm2, %v3878_v50  ;;  %v3677_v23 = vld [vmem:[#allocation2 + $0x20] ss:$8 sps:$4 sm:$0xff]  }
 0x6e7   :  { %2328 = vmatprep.subr.bf16.mxu0 %v3673_v10  ;;  %v3725_v10 = vld [vmem:[#allocation2 + $0x120] ss:$8 sps:$4 sm:$0xff]  }
 0x7b8   :  { %v4549_v57 = vpop.f32.mrb[2].mxu0 }
 0x7b9   :  { %v1644_v59 = vrot.slane %v4549_v57, %v4123_v63  ;;  %v3315_v60 = vpop.f32.mrb[3].mxu0 }
 0x7bb   :  { %v1645_v61 = vsub.f32 %v4527_v49, %v1644_v59  ;;  %v1646_v28 = vsub.f32 %v4525_v48, %v1644_v59 }
 0x7bd   :  { %v1647_v62 = vmul.f32 %v1645_v61, %v1645_v61  ;;  %v1648_v0 = vmul.f32 %v1646_v28, %v1646_v28 }
 0x7bf   :  { %v1649_v2 = vsel %vm701_vm9, %v1648_v0, 0.0 }
 0x7c0   :  { %v1650_v3 = vadd.f32 %v1649_v2, %v1647_v62 }
 0x7c2   :  { %v1651_v4 = vrot.slane %v1650_v3, 4 }
 0x7c4   :  { %v1652_v5 = vadd.f32 %v1651_v4, %v1650_v3 }
 0x7c6   :  { %v1653_v6 = vrot.slane %v1652_v5, 2 }
 0x7c8   :  { %v1654_v7 = vadd.f32 %v1653_v6, %v1652_v5 }
 0x7ca   :  { %v1655_v8 = vrot.slane %v1654_v7, 1 }
 0x7cc   :  { %v1656_v9 = vadd.f32 %v1655_v8, %v1654_v7  ;;  %v3719_v8 = vld [vmem:[#allocation2 + $0x100] ss:$8 sps:$4 sm:$0xff]  }
 0x7ce   :  { %3349 = vmatmul.mubr.f32.vlgmr.msra.gmra.mrb[24].mxu1 %v1656_v9  ;;  %v3724_v9 = vld [vmem:[#allocation2 + $0x114] ss:$8 sps:$4 sm:$0xff]  }
 0x8a1   :  { %v1723_v11 = vpop.f32.mrb[24].mxu1 }
 0x8a2   :  { %v1727_v12 = vmul.f32 0.02, %v1723_v11  ;;  %v3350_v13 = vpop.f32.mrb[25].mxu1  ;;  %v3730_v11 = vld [vmem:[#allocation2 + $0x134] ss:$8 sps:$4 sm:$0xff]  }
 0x8a3   :  { %v3733_v13 = vld [vmem:[#allocation2 + $0x144] ss:$8 sps:$4 sm:$0xff]  }
 0x8a4   :  { %v1728_v14 = vadd.f32 1e-05, %v1727_v12  ;;  %v3728_v12 = vld [vmem:[#allocation2 + $0x130] ss:$8 sps:$4 sm:$0xff]  }
 0x8a6   :  { %3817 = vrsqrt.f32 %v1728_v14  ;;  %v3731_v14 = vld [vmem:[#allocation2 + $0x140] ss:$8 sps:$4 sm:$0xff]  }
 0x8b0   :  { %v3818_v17 = vpop.eup %3817 }
 0x8b1   :  { %3356 = vmatmul.mubr.msk.f32.vlgmr.msra.gmra.mrb[8].mxu0 %vm1567_vm14, %v3818_v17  ;;  %v3739_v17 = vld [vmem:[#allocation2 + $0x164] ss:$8 sps:$4 sm:$0xff]  }
 0x8b2   :  { %2329 = vmatpush1.bf16.msra.mxu0 %v3671_v15  ;;  %v3736_v15 = vld [vmem:[#allocation2 + $0x154] ss:$8 sps:$4 sm:$0xff]  }
 0x8b3   :  { %2330 = vmatprep.subr.bf16.mxu0 %v3676_v16  ;;  %v3734_v16 = vld [vmem:[#allocation2 + $0x150] ss:$8 sps:$4 sm:$0xff]  }
 0x8b6   :  { %2331 = vmatpush1.bf16.msra.mxu0 %v3674_v20  ;;  %v3737_v20 = vld [vmem:[#allocation2 + $0x160] ss:$8 sps:$4 sm:$0xff]  }
 0x8b7   :  { %2332 = vmatprep.subr.bf16.mxu0 %v3679_v21  ;;  %v3742_v21 = vld [vmem:[#allocation2 + $0x174] ss:$8 sps:$4 sm:$0xff]  }
 0x8ba   :  { %2333 = vmatpush1.bf16.msra.mxu0 %v3677_v23  ;;  %v3740_v23 = vld [vmem:[#allocation2 + $0x170] ss:$8 sps:$4 sm:$0xff]  }
 0x8bb   :  { %2334 = vmatprep.subr.bf16.mxu0 %v3682_v24  ;;  %v3745_v24 = vld [vmem:[#allocation2 + $0x184] ss:$8 sps:$4 sm:$0xff]  }
 0x8be   :  { %2335 = vmatpush1.bf16.msra.mxu0 %v3680_v25  ;;  %v3743_v25 = vld [vmem:[#allocation2 + $0x180] ss:$8 sps:$4 sm:$0xff]  }
 0x8bf   :  { %2336 = vmatprep.subr.bf16.mxu0 %v3685_v27  ;;  %v3748_v27 = vld [vmem:[#allocation2 + $0x194] ss:$8 sps:$4 sm:$0xff]  }
 0x8c2   :  { %2337 = vmatpush1.bf16.msra.mxu0 %v3683_v29  ;;  %v3746_v29 = vld [vmem:[#allocation2 + $0x190] ss:$8 sps:$4 sm:$0xff]  }
 0x8c3   :  { %2338 = vmatprep.subr.bf16.mxu0 %v3688_v30  ;;  %v3751_v30 = vld [vmem:[#allocation2 + $0x1a4] ss:$8 sps:$4 sm:$0xff]  }
 0x8c6   :  { %2339 = vmatpush1.bf16.msra.mxu0 %v3686_v31  ;;  %v3749_v31 = vld [vmem:[#allocation2 + $0x1a0] ss:$8 sps:$4 sm:$0xff]  }
 0x8c7   :  { %2340 = vmatprep.subr.bf16.mxu0 %v3691_v32  ;;  %v3754_v32 = vld [vmem:[#allocation2 + $0x1b4] ss:$8 sps:$4 sm:$0xff]  }
 0x8ca   :  { %2341 = vmatpush1.bf16.msra.mxu0 %v3689_v33  ;;  %v3752_v33 = vld [vmem:[#allocation2 + $0x1b0] ss:$8 sps:$4 sm:$0xff]  }
 0x8cb   :  { %2342 = vmatprep.subr.bf16.mxu0 %v3694_v34  ;;  %v3757_v34 = vld [vmem:[#allocation2 + $0x1c4] ss:$8 sps:$4 sm:$0xff]  }
 0x8ce   :  { %2343 = vmatpush1.bf16.msra.mxu0 %v3692_v36  ;;  %v3755_v36 = vld [vmem:[#allocation2 + $0x1c0] ss:$8 sps:$4 sm:$0xff]  }
 0x8cf   :  { %2344 = vmatprep.subr.bf16.mxu0 %v3697_v37  ;;  %v3760_v37 = vld [vmem:[#allocation2 + $0x1d4] ss:$8 sps:$4 sm:$0xff]  }
 0x8d2   :  { %2345 = vmatpush1.bf16.msra.mxu0 %v3695_v38  ;;  %v3758_v38 = vld [vmem:[#allocation2 + $0x1d0] ss:$8 sps:$4 sm:$0xff]  }
 0x8d3   :  { %2346 = vmatprep.subr.bf16.mxu0 %v3700_v39  ;;  %v3763_v39 = vld [vmem:[#allocation2 + $0x1e4] ss:$8 sps:$4 sm:$0xff]  }
 0x8d6   :  { %2347 = vmatpush1.bf16.msra.mxu0 %v3698_v40  ;;  %v3761_v40 = vld [vmem:[#allocation2 + $0x1e0] ss:$8 sps:$4 sm:$0xff]  }
 0x8d7   :  { %2348 = vmatprep.subr.bf16.mxu0 %v3703_v41  ;;  %v3766_v41 = vld [vmem:[#allocation2 + $0x1f4] ss:$8 sps:$4 sm:$0xff]  }
 0x8da   :  { %2349 = vmatpush1.bf16.msra.mxu0 %v3701_v43  ;;  %v3764_v43 = vld [vmem:[#allocation2 + $0x1f0] ss:$8 sps:$4 sm:$0xff]  }
 0x8db   :  { %2350 = vmatprep.subr.bf16.mxu0 %v3706_v44 }
 0x8de   :  { %2351 = vmatpush1.bf16.msra.mxu0 %v3704_v46  ;;  %v3769_v46 = vld [vmem:[#allocation2 + $0x204] ss:$8 sps:$4 sm:$0xff]  }
 0x8df   :  { %2352 = vmatprep.subr.bf16.mxu0 %v3709_v47  ;;  %v3767_v47 = vld [vmem:[#allocation2 + $0x200] ss:$8 sps:$4 sm:$0xff]  }
 0x8e2   :  { %2353 = vmatpush1.bf16.msra.mxu0 %v3707_v51 }
 0x8e3   :  { %2354 = vmatprep.subr.bf16.mxu0 %v3712_v35  ;;  %v3772_v35 = vld [vmem:[#allocation2 + $0x214] ss:$8 sps:$4 sm:$0xff]  }
 0x8e6   :  { %2355 = vmatpush1.bf16.msra.mxu0 %v3710_v52  ;;  %v3770_v52 = vld [vmem:[#allocation2 + $0x210] ss:$8 sps:$4 sm:$0xff]  }
 0x8e7   :  { %2356 = vmatprep.subr.bf16.mxu0 %v3715_v53  ;;  %v3775_v53 = vld [vmem:[#allocation2 + $0x224] ss:$8 sps:$4 sm:$0xff]  }
 0x8ea   :  { %2357 = vmatpush1.bf16.msra.mxu0 %v3713_v1  ;;  %v3773_v1 = vld [vmem:[#allocation2 + $0x220] ss:$8 sps:$4 sm:$0xff]  }
 0x8eb   :  { %2358 = vmatprep.subr.bf16.mxu0 %v3718_v54  ;;  %v3778_v54 = vld [vmem:[#allocation2 + $0x234] ss:$8 sps:$4 sm:$0xff]  }
 0x8ee   :  { %2359 = vmatpush1.bf16.msra.mxu0 %v3716_v18  ;;  %v3776_v18 = vld [vmem:[#allocation2 + $0x230] ss:$8 sps:$4 sm:$0xff]  }
 0x8ef   :  { %2369 = vmatprep.subr.bf16.mxu0 %v3721_v55  ;;  %v3781_v55 = vld [vmem:[#allocation2 + $0x244] ss:$8 sps:$4 sm:$0xff]  }
 0x984   :  { %v1799_v22 = vpop.f32.mrb[8].mxu0 }
 0x985   :  { %v1806_v56 = vmul.f32 %v1804_v19, %v1799_v22  ;;  %v3357_v59 = vpop.f32.mrb[9].mxu0  ;;  %v3779_v19 = vld [vmem:[#allocation2 + $0x240] ss:$8 sps:$4 sm:$0xff]   ;;  %v3784_v22 = vld [vmem:[#allocation2 + $0x254] ss:$8 sps:$4 sm:$0xff]  }
 0x986   :  { %v3787_v59 = vld [vmem:[#allocation2 + $0x264] ss:$8 sps:$4 sm:$0xff]  }
 0x987   :  { %v1807_v60 = vmul.f32 %v1806_v56, %v4549_v57  ;;  %v1815_v28 = vrot.slane %v1806_v56, %v4123_v63  ;;  %v3782_v56 = vld [vmem:[#allocation2 + $0x250] ss:$8 sps:$4 sm:$0xff]  }
 0x989   :  { %v1809_v61 = vrot.slane %v1807_v60, 6  ;;  %v1816_v0 = vmul.f32 %v1815_v28, %v4527_v49  ;;  %v1817_v2 = vmul.f32 %v1815_v28, %v4525_v48  ;;  %v3727_v48 = vld [vmem:[#allocation2 + $0x124] ss:$8 sps:$4 sm:$0xff]   ;;  %v3790_v60 = vld [vmem:[#allocation2 + $0x274] ss:$8 sps:$4 sm:$0xff]  }
 0x98b   :  { %v1811_v62 = vsub.f32 %v4521_v26, %v1809_v61  ;;  %v3788_v61 = vld [vmem:[#allocation2 + $0x270] ss:$8 sps:$4 sm:$0xff]  }
 0x98d   :  { %v1821_v3 = vrot.slane %v1811_v62, %v663_v42  ;;  %v3722_v42 = vld [vmem:[#allocation2 + $0x110] ss:$8 sps:$4 sm:$0xff]   ;;  %v3791_v62 = vld [vmem:[%s4718_s11 + $0x40] sm:$0xff]  }
 0x98e   :  { %3163 = vmatprep.subr.bf16.mxu1 %v3791_v62 }
 0x98f   :  { %v4565_v4 = vadd.f32 %v1821_v3, %v1816_v0  ;;  %v4567_v5 = vadd.f32 %v1821_v3, %v1817_v2  ;;  %v3792_v0 = vld [vmem:[%s4718_s11] sm:$0xff]   ;;  %v3793_v2 = vld [vmem:[%s4718_s11 + $0x48] sm:$0xff]  }
 0x990   :  { %3164 = vmatpush3.bf16.msra.mxu1 %v3792_v0  ;;  %v3794_v3 = vld [vmem:[%s4718_s11 + $0x8] sm:$0xff]  }
 0x991   :  { %v1825_v6 = vrot.slane %v4565_v4, 2  ;;  %v1829_v57 = vrot.slane %v4565_v4, 6  ;;  %v1831_v26 = vpack.c.bf16 %v4565_v4, %v4565_v4  ;;  %v1827_v44 = vrot.slane %v4565_v4, 4  ;;  %3165 = vmatprep.subr.bf16.mxu1 %v3793_v2  ;;  %v3795_v4 = vld [vmem:[%s4718_s11 + $0x50] sm:$0xff]  }
 0x992   :  { %v1835_v28 = vpack.c.bf16 %v4567_v5, %v4567_v5  ;;  %v3796_v5 = vld [vmem:[%s4718_s11 + $0x10] sm:$0xff]   ;;  %v3055_v2 = vld [vmem:[%s4717_s10 + $0x1] ss:$4 sm:$0x3] }
 0x993   :  { %v1832_v7 = vpack.c.bf16 %v1825_v6, %v1825_v6  ;;  %v1834_v49 = vpack.c.bf16 %v1829_v57, %v1829_v57  ;;  %v1833_v51 = vpack.c.bf16 %v1827_v44, %v1827_v44  ;;  %v3797_v6 = vld [vmem:[%s4718_s11 + $0x58] sm:$0xff]  }
 0x994   :  { %3166 = vmatpush3.bf16.msra.mxu1 %v3794_v3  ;;  %v3798_v57 = vld [vmem:[%s4718_s11 + $0x18] sm:$0xff]   ;;  %v3056_v3 = vld [vmem:[%s4717_s10 + $0x2] ss:$4 sm:$0x3] }
 0x995   :  { %2360 = vmatprep.mubr.bf16.mxu0 %v1832_v7  ;;  %3167 = vmatprep.subr.bf16.mxu1 %v3795_v4  ;;  %v3799_v7 = vld [vmem:[%s4718_s11 + $0x60] sm:$0xff]   ;;  %v2502_v4 = vrot.slane %v3055_v2, %v4123_v63 }
 0x996   :  { %2361 = vmatmul.mubr.bf16.vlgmr.msra.gmra.mrb[12].mxu0 %v1831_v26  ;;  %v3801_v26 = vld [vmem:[%s4718_s11 + $0x68] sm:$0xff]  }
 0x997   :  { %2370 = vmatpush1.bf16.msra.mxu0 %v3719_v8  ;;  %2401 = vmatprep.mubr.bf16.mxu0 %v1834_v49  ;;  %v3800_v8 = vld [vmem:[%s4718_s11 + $0x20] sm:$0xff]   ;;  %v3803_v49 = vld [vmem:[%s4718_s11 + $0x70] sm:$0xff]  }
 0x998   :  { %2371 = vmatprep.subr.bf16.mxu0 %v3724_v9  ;;  %3168 = vmatpush3.bf16.msra.mxu1 %v3796_v5  ;;  %v3802_v9 = vld [vmem:[%s4718_s11 + $0x28] sm:$0xff]  }
 0x999   :  { %3169 = vmatprep.subr.bf16.mxu1 %v3797_v6 }
 0x99b   :  { %2372 = vmatpush1.bf16.msra.mxu0 %v3722_v42  ;;  %v3804_v42 = vld [vmem:[%s4718_s11 + $0x30] sm:$0xff]  }
 0x99c   :  { %2373 = vmatprep.subr.bf16.mxu0 %v3727_v48  ;;  %3170 = vmatpush3.bf16.msra.mxu1 %v3798_v57  ;;  %v3805_v48 = vld [vmem:[%s4718_s11 + $0x78] sm:$0xff]  }
 0x99d   :  { %3171 = vmatprep.subr.bf16.mxu1 %v3799_v7 }
 0x99f   :  { %2374 = vmatpush1.bf16.msra.mxu0 %v3725_v10  ;;  %v3806_v10 = vld [vmem:[%s4718_s11 + $0x38] sm:$0xff]   ;;  %s3881_s11 = smov [#allocation5]  }
 0x9a0   :  { %2375 = vmatprep.subr.bf16.mxu0 %v3730_v11  ;;  %3172 = vmatpush3.bf16.msra.mxu1 %v3800_v8  ;;  %v1916_v11 = vld [vmem:[%s4717_s10] ss:$4 sm:$0x3]  ;;  %v2515_v8 = vrot.slane %v3056_v3, %v4123_v63  ;;  %s2851_s9 = sshll.u32 %s3881_s11, 4  ;;  %s2852_s9 = int_to_ptr.vmem [resolvable:$true] %s2851_s9 }
 0x9a1   :  { %3173 = vmatprep.subr.bf16.mxu1 %v3801_v26  ;;  %s3847_s19 = scalar_lea.vmem %s2852_s9, 32  ;;  %p3852_p9 = scmp.lt.s32.totalorder %s2852_s9, %s2852_s9 }
 0x9a2   :  { %p3848_p8 = scmp.ne.s32.totalorder %s2852_s9, %s3847_s19  ;;  %p3853_p10 = scmp.lt.s32.totalorder %s3847_s19, %s3847_s19 }
 0x9a3   :  { %2376 = vmatpush1.bf16.msra.mxu0 %v3728_v12  ;;  %v4630_v12 = vsub.s32 1, %v4120_v58 }
 0x9a4   :  { %2377 = vmatprep.subr.bf16.mxu0 %v3733_v13  ;;  %3174 = vmatpush3.bf16.msra.mxu1 %v3802_v9  ;;  %v1921_v13 = vrot.slane %v1916_v11, %v4123_v63  ;;  %v3808_v63 = vld [vmem:[%s4720_s13 + $0x8] sm:$0xff]   ;;  %p3854_p11 = por %p3853_p10, %p3852_p9 }
 0x9a5   :  { %3175 = vmatprep.subr.bf16.mxu1 %v3803_v49  ;;  %v2506_v6 = vrot.slane %v3055_v2, %v4630_v12  ;;  %v2519_v9 = vrot.slane %v3056_v3, %v4630_v12 }
 0x9a6   :  { %p3855_p12 = pnand %p3854_p11, %p3848_p8 }
 0x9a7   :  { %2378 = vmatpush1.bf16.msra.mxu0 %v3731_v14  ;;  %v1925_v14 = vrot.slane %v1916_v11, %v4630_v12  ;;  %v3809_v12 = vld [vmem:[%s4720_s13 + $0x10] sm:$0xff]  }
 0x9a8   :  { %2379 = vmatprep.subr.bf16.mxu0 %v3736_v15  ;;  %3176 = vmatpush3.bf16.msra.mxu1 %v3804_v42 }
 0x9a9   :  { %3177 = vmatprep.subr.bf16.mxu1 %v3805_v48 }
 0x9ab   :  { %2380 = vmatpush1.bf16.msra.mxu0 %v3734_v16 }
 0x9ac   :  { %2381 = vmatprep.subr.bf16.mxu0 %v3739_v17  ;;  %3178 = vmatpush3.bf16.msra.mxu1 %v3806_v10 }
 0x9ad   :  { %3358 = vmatprep.subr.bf16.mxu1 %v3878_v50 }
 0x9af   :  { %2382 = vmatpush1.bf16.msra.mxu0 %v3737_v20 }
 0x9b0   :  { %2383 = vmatprep.subr.bf16.mxu0 %v3742_v21 }
 0x9b3   :  { %2384 = vmatpush1.bf16.msra.mxu0 %v3740_v23 }
 0x9b4   :  { %2385 = vmatprep.subr.bf16.mxu0 %v3745_v24 }
 0x9b7   :  { %2386 = vmatpush1.bf16.msra.mxu0 %v3743_v25 }
 0x9b8   :  { %2387 = vmatprep.subr.bf16.mxu0 %v3748_v27 }
 0x9bb   :  { %2388 = vmatpush1.bf16.msra.mxu0 %v3746_v29 }
 0x9bc   :  { %2389 = vmatprep.subr.bf16.mxu0 %v3751_v30 }
 0x9bf   :  { %2390 = vmatpush1.bf16.msra.mxu0 %v3749_v31 }
 0x9c0   :  { %2391 = vmatprep.subr.bf16.mxu0 %v3754_v32 }
 0x9c3   :  { %2392 = vmatpush1.bf16.msra.mxu0 %v3752_v33 }
 0x9c4   :  { %2393 = vmatprep.subr.bf16.mxu0 %v3757_v34 }
 0x9c7   :  { %2394 = vmatpush1.bf16.msra.mxu0 %v3755_v36 }
 0x9c8   :  { %2395 = vmatprep.subr.bf16.mxu0 %v3760_v37 }
 0x9cb   :  { %2396 = vmatpush1.bf16.msra.mxu0 %v3758_v38 }
 0x9cc   :  { %2397 = vmatprep.subr.bf16.mxu0 %v3763_v39 }
 0x9cf   :  { %2398 = vmatpush1.bf16.msra.mxu0 %v3761_v40 }
 0x9d0   :  { %2399 = vmatprep.subr.bf16.mxu0 %v3766_v41 }
 0x9d3   :  { %2400 = vmatpush1.bf16.msra.mxu0 %v3764_v43 }
 0x9d4   :  { %2410 = vmatprep.subr.bf16.mxu0 %v3769_v46 }
 0x9d6   :  { %2402 = vmatmul.mubr.bf16.vlgmr.msra.gmra.mrb[12].mxu0 %v1833_v51 }
 0x9d7   :  { %2411 = vmatpush1.bf16.msra.mxu0 %v3767_v47  ;;  %2442 = vmatprep.mubr.bf16.mxu0 %v3880_v45  ;;  %v3785_v45 = vld [vmem:[#allocation2 + $0x260] ss:$8 sps:$4 sm:$0xff]  }
 0x9d8   :  { %2412 = vmatprep.subr.bf16.mxu0 %v3772_v35 }
 0x9db   :  { %2413 = vmatpush1.bf16.msra.mxu0 %v3770_v52 }
 0x9dc   :  { %2414 = vmatprep.subr.bf16.mxu0 %v3775_v53 }
 0x9df   :  { %2415 = vmatpush1.bf16.msra.mxu0 %v3773_v1 }
 0x9e0   :  { %2416 = vmatprep.subr.bf16.mxu0 %v3778_v54 }
 0x9e3   :  { %2417 = vmatpush1.bf16.msra.mxu0 %v3776_v18 }
 0x9e4   :  { %2418 = vmatprep.subr.bf16.mxu0 %v3781_v55 }
 0x9e7   :  { %2419 = vmatpush1.bf16.msra.mxu0 %v3779_v19 }
 0x9e8   :  { %2420 = vmatprep.subr.bf16.mxu0 %v3784_v22 }
 0x9eb   :  { %2421 = vmatpush1.bf16.msra.mxu0 %v3782_v56 }
 0x9ec   :  { %2422 = vmatprep.subr.bf16.mxu0 %v3787_v59 }
 0x9ef   :  { %2423 = vmatpush1.bf16.msra.mxu0 %v3785_v45 }
 0x9f0   :  { %2424 = vmatprep.subr.bf16.mxu0 %v3790_v60 }
 0x9f3   :  { %2425 = vmatpush1.bf16.msra.mxu0 %v3788_v61 }
 0x9f6   :  { %2443 = vmatmul.mubr.bf16.vlgmr.msra.gmra.mrb[12].mxu0 %v1835_v28 }
 0xac9   :  { %v2444_v15 = vpop.f32.mrb[12].mxu0 }
 0xaca   :  { %v3480_v16 = vadd.f32 %v2444_v15, %v1921_v13  ;;  %v2446_v17 = vpop.f32.mrb[13].mxu0  ;;  %v3810_v15 = vld [vmem:[%s4720_s13 + $0x18] sm:$0xff]  }
 0xacb   :  { %v3481_v20 = vadd.f32 %v2446_v17, %v1925_v14  ;;  %v2448_v21 = vpop.f32.mrb[14].mxu0  ;;  %v3807_v14 = vld [vmem:[%s4720_s13] sm:$0xff]   ;;  %v3812_v17 = vld [vmem:[%s4720_s13 + $0x28] sm:$0xff]  }
 0xacc   :  { %v2455_v23 = vsel %vm701_vm9, %v3480_v16, 0.0  ;;  %v2449_v24 = vpop.f32.mrb[15].mxu0  ;;  %v3814_v21 = vld [vmem:[%s4720_s13 + $0x38] sm:$0xff]  }
 0xacd   :  { %v2456_v25 = vrot.slane %v2455_v23, 4  ;;  %v2462_v27 = vsel %vm701_vm9, %v3481_v20, 0.0  ;;  %v3057_v24 = vld [vmem:[%s4719_s12] ss:$0 sm:$0xff] }
 0xace   :  { %v2463_v29 = vrot.slane %v2462_v27, 4 }
 0xacf   :  { %v2457_v30 = vadd.f32 %v2456_v25, %v2455_v23 }
 0xad0   :  { %v2464_v31 = vadd.f32 %v2463_v29, %v2462_v27 }
 0xad1   :  { %v2458_v58 = vrot.slane %v2457_v30, 2 }
 0xad2   :  { %v2465_v32 = vrot.slane %v2464_v31, 2 }
 0xad3   :  { %v2459_v33 = vadd.f32 %v2458_v58, %v2457_v30 }
 0xad4   :  { %v2466_v34 = vadd.f32 %v2465_v32, %v2464_v31 }
 0xad5   :  { %v2460_v36 = vrot.slane %v2459_v33, 1 }
 0xad6   :  { %v2467_v37 = vrot.slane %v2466_v34, 1 }
 0xad7   :  { %v2461_v38 = vadd.f32 %v2460_v36, %v2459_v33 }
 0xad8   :  { %v2468_v39 = vadd.f32 %v2467_v37, %v2466_v34 }
 0xad9   :  { %v2470_v40 = vmul.f32 0.5, %v2461_v38 }
 0xada   :  { %v2471_v41 = vmul.f32 0.5, %v2468_v39 }
 0xadb   :  { %v2472_v43 = vsub.f32 %v3480_v16, %v2470_v40  ;;  %v3811_v16 = vld [vmem:[%s4720_s13 + $0x20] sm:$0xff]  }
 0xadc   :  { %v2473_v44 = vsub.f32 %v3481_v20, %v2471_v41  ;;  %v3813_v20 = vld [vmem:[%s4720_s13 + $0x30] sm:$0xff]  }
 0xadd   :  { %v2474_v46 = vmul.f32 %v2472_v43, %v2472_v43 }
 0xade   :  { %v2475_v47 = vmul.f32 %v2473_v44, %v2473_v44 }
 0xadf   :  { %v2476_v51 = vsel %vm701_vm9, %v2474_v46, 0.0 }
 0xae0   :  { %v2477_v35 = vrot.slane %v2476_v51, 4  ;;  %v2483_v52 = vsel %vm701_vm9, %v2475_v47, 0.0 }
 0xae1   :  { %v2484_v53 = vrot.slane %v2483_v52, 4 }
 0xae2   :  { %v2478_v1 = vadd.f32 %v2477_v35, %v2476_v51 }
 0xae3   :  { %v2485_v54 = vadd.f32 %v2484_v53, %v2483_v52 }
 0xae4   :  { %v2479_v18 = vrot.slane %v2478_v1, 2 }
 0xae5   :  { %v2486_v55 = vrot.slane %v2485_v54, 2 }
 0xae6   :  { %v2480_v19 = vadd.f32 %v2479_v18, %v2478_v1 }
 0xae7   :  { %v2487_v22 = vadd.f32 %v2486_v55, %v2485_v54  ;;  %v3074_v54 = vld [vmem:[%s4719_s12 + $0x1] ss:$0 sm:$0xff]  ;;  %v3075_v55 = vld [vmem:[%s4719_s12 + $0x2] ss:$0 sm:$0xff] }
 0xae8   :  { %v2481_v56 = vrot.slane %v2480_v19, 1 }
 0xae9   :  { %v2488_v59 = vrot.slane %v2487_v22, 1 }
 0xaea   :  { %v2482_v45 = vadd.f32 %v2481_v56, %v2480_v19 }
 0xaeb   :  { %v2489_v60 = vadd.f32 %v2488_v59, %v2487_v22  ;;  %v3076_v59 = vld [vmem:[%s4721_s14] ss:$0 sm:$0xff] }
 0xaec   :  { %v2490_v61 = vmul.f32 0.5, %v2482_v45 }
 0xaed   :  { %v2491_v28 = vmul.f32 0.5, %v2489_v60 }
 0xaee   :  { %v2492_v62 = vadd.f32 1e-05, %v2490_v61 }
 0xaef   :  { %v2493_v0 = vadd.f32 1e-05, %v2491_v28 }
 0xaf0   :  { %3819 = vrsqrt.f32 %v2492_v62 }
 0xaf1   :  { %3821 = vrsqrt.f32 %v2493_v0 }
 0xafa   :  { %v3820_v5 = vpop.eup %3819 }
 0xafb   :  { %v3822_v57 = vpop.eup %3821  ;;  %v2496_v7 = vmul.f32 %v3820_v5, %v2472_v43 }
 0xafc   :  { %v2497_v26 = vmul.f32 %v3822_v57, %v2473_v44 }
 0xafd   :  { %v2509_v49 = vmul.f32 %v2502_v4, %v2496_v7 }
 0xafe   :  { %v2510_v42 = vmul.f32 %v2506_v6, %v2497_v26 }
 0xaff   :  { %v2522_v48 = vadd.f32 %v2515_v8, %v2509_v49 }
 0xb00   :  { %v2523_v10 = vadd.f32 %v2519_v9, %v2510_v42 }
 0xb01   :  { %v2524_v13 = vpack.c.bf16 %v2522_v48, %v2522_v48 }
 0xb02   :  { %v2525_v11 = vpack.c.bf16 %v2523_v10, %v2523_v10 }
 0xb04   :  { %2691 = vmatprep.mubr.bf16.mxu1 %v2525_v11 }
 0xb05   :  { %2692 = vmatmul.mubr.bf16.vlgmr.msra.gmra.mrb[28].mxu1 %v2524_v13 }
 0xb06   :  { %3374 = vmatprep.mubr.msk.bf16.mxu1 %vm3877_vm2, %v3878_v50  ;;  %3359 = vmatpush3.bf16.msra.mxu1 %v3807_v14 }
 0xb07   :  { %3360 = vmatprep.subr.bf16.mxu1 %v3878_v50 }
 0xb0a   :  { %3361 = vmatpush3.bf16.msra.mxu1 %v3808_v63 }
 0xb0b   :  { %3362 = vmatprep.subr.bf16.mxu1 %v3878_v50 }
 0xb0e   :  { %3363 = vmatpush3.bf16.msra.mxu1 %v3809_v12 }
 0xb0f   :  { %3364 = vmatprep.subr.bf16.mxu1 %v3878_v50 }
 0xb12   :  { %3365 = vmatpush3.bf16.msra.mxu1 %v3810_v15 }
 0xb13   :  { %3366 = vmatprep.subr.bf16.mxu1 %v3878_v50 }
 0xb16   :  { %3367 = vmatpush3.bf16.msra.mxu1 %v3811_v16 }
 0xb17   :  { %3368 = vmatprep.subr.bf16.mxu1 %v3878_v50 }
 0xb1a   :  { %3369 = vmatpush3.bf16.msra.mxu1 %v3812_v17 }
 0xb1b   :  { %3370 = vmatprep.subr.bf16.mxu1 %v3878_v50 }
 0xb1e   :  { %3371 = vmatpush3.bf16.msra.mxu1 %v3813_v20 }
 0xb1f   :  { %3372 = vmatprep.subr.bf16.mxu1 %v3878_v50 }
 0xb22   :  { %3373 = vmatpush3.bf16.msra.mxu1 %v3814_v21 }
 0xbd8   :  { %v3179_v23 = vpop.f32.mrb[28].mxu1 }
 0xbd9   :  { %v3180_v25 = vpop.f32.mrb[29].mxu1 }
 0xbda   :  { %v3181_v27 = vadd.f32 %v3180_v25, %v3179_v23  ;;  %v3182_v29 = vpop.f32.mrb[30].mxu1 }
 0xbdb   :  { %v3183_v30 = vpop.f32.mrb[31].mxu1 }
 0xbdc   :  { %v2694_v31 = vadd.f32 %v3181_v27, %v3057_v24 }
 0xbde   :  { %v2701_v58 = vsel %vm701_vm9, %v2694_v31, 0.0 }
 0xbdf   :  { %v2702_v32 = vrot.slane %v2701_v58, 4 }
 0xbe1   :  { %v2703_v33 = vadd.f32 %v2702_v32, %v2701_v58 }
 0xbe3   :  { %v2704_v50 = vrot.slane %v2703_v33, 2 }
 0xbe5   :  { %v2705_v34 = vadd.f32 %v2704_v50, %v2703_v33 }
 0xbe7   :  { %v2706_v36 = vrot.slane %v2705_v34, 1 }
 0xbe9   :  { %v2707_v37 = vadd.f32 %v2706_v36, %v2705_v34 }
 0xbeb   :  { %v2708_v38 = vmul.f32 0.5, %v2707_v37 }
 0xbed   :  { %v2709_v39 = vsub.f32 %v2694_v31, %v2708_v38 }
 0xbef   :  { %v2710_v40 = vmul.f32 %v2709_v39, %v2709_v39 }
 0xbf1   :  { %v2711_v41 = vsel %vm701_vm9, %v2710_v40, 0.0 }
 0xbf2   :  { %v2712_v43 = vrot.slane %v2711_v41, 4 }
 0xbf4   :  { %v2713_v44 = vadd.f32 %v2712_v43, %v2711_v41 }
 0xbf6   :  { %v2714_v46 = vrot.slane %v2713_v44, 2 }
 0xbf8   :  { %v2715_v47 = vadd.f32 %v2714_v46, %v2713_v44 }
 0xbfa   :  { %v2716_v51 = vrot.slane %v2715_v47, 1 }
 0xbfc   :  { %v2717_v35 = vadd.f32 %v2716_v51, %v2715_v47 }
 0xbfe   :  { %v2718_v52 = vmul.f32 0.5, %v2717_v35 }
 0xc00   :  { %v2719_v53 = vadd.f32 1e-05, %v2718_v52 }
 0xc02   :  { %3823 = vrsqrt.f32 %v2719_v53 }
 0xc0c   :  { %v3824_v1 = vpop.eup %3823 }
 0xc0d   :  { %v2721_v18 = vmul.f32 %v3824_v1, %v2709_v39 }
 0xc0f   :  { %v2726_v19 = vmul.f32 %v3074_v54, %v2721_v18 }
 0xc11   :  { %v2731_v22 = vadd.f32 %v3075_v55, %v2726_v19 }
 0xc13   :  { %v2732_v56 = vpack.c.bf16 %v2731_v22, %v2731_v22 }
 0xc15   :  { %3375 = vmatmul.mubr.bf16.vlgmr.msra.gmra.mrb[32].mxu1 %v2732_v56 }
 0xce8   :  { %v2838_v45 = vpop.f32.mrb[32].mxu1 }
 0xce9   :  { %v2839_v60 = vadd.f32 %v3076_v59, %v2838_v45  ;;  %v3376_v61 = vpop.f32.mrb[33].mxu1 }
 0xcea   :  { %v2841_v28 = vpop.f32.mrb[34].mxu1 }
 0xceb   :  { %2844 = vst [vmem:[#allocation5] sm:$0x3] %v2839_v60  ;;  %v3377_v62 = vpop.f32.mrb[35].mxu1 }
 0xcec   :  { %3858 = shalt.err (!%p3855_p12)
}
 0xced   :  { %s3859_s14 = scalar_lea.hbm %s4722_s15, 32 }
 0xcee   :  { %p3860_p13 = scmp.ne.s32.totalorder %s4722_s15, %s3859_s14  ;;  %p3863_p0 = scmp.lt.u32.totalorder %s3859_s14, %s4722_s15 }
 0xcf0   :  { %p3865_p1 = pnand %p3863_p0, %p3860_p13 }
 0xcf2   :  { %3868 = shalt.err (!%p3865_p1)
}
 0xcf3   :  { %2854 = dma.vmem_to_hbm [thread:$0]  %s2852_s9, 32, %s4722_s15, [#allocation4]  }
 0xcf4   :  { %3871 = dma.done.wait [#allocation4], 32  }
 0xcf5   :  { %3872 = vsyncadd [#allocation4], 4294967264 }
 0xcf6   :  { %2858 = vsyncpa [#allocation3], 1 }
 0xcf7   :  { %2859 = vsyncpa [#allocation4], 1 }

</bundles_post_ra>
